<compile_context>
chip_gen: v6e
topology: v6e:2x2x1
jax: 0.10.0
libtpu: 0.0.40
codegen_flags: <defaults>
</compile_context>

<pallas_src>
import functools

import jax
import jax.numpy as jnp
from jax.experimental import pallas as pl
from jax.experimental.pallas import tpu as pltpu

CP = 8       # all channel axes zero-padded to the f32 sublane tile (8)
APRON = 128  # lane-aligned zero halo; requires W + 1 <= 128


def _round_up(x, m):
    return (x + m - 1) // m * m


# ---------------------------------------------------------------------------
# In-kernel helper
# ---------------------------------------------------------------------------
def _patch3x3(x, W, mask):
    """3x3 im2col of a lane-flattened image; boundary via a precomputed 0/1 mask.

    x:    (CP, L) compute-dtype, row-major HxW image in the first H*W lanes.
    mask: (9*CP, L) compute-dtype 0/1 boundary mask (precomputed in the wrapper).
    Returns (9*CP, L): row block k = (dy+1)*3+(dx+1) holds x shifted by (dy,dx),
    zeroed where the neighbour falls outside the HxW image.
    """
    C, L = x.shape
    apron = jnp.zeros((C, APRON), x.dtype)
    xw = jnp.concatenate([apron, x, apron], axis=1)       # lane-aligned concat
    taps = []
    for dy in (-1, 0, 1):
        for dx in (-1, 0, 1):
            s = dy * W + dx
            taps.append(xw[:, APRON + s:APRON + s + L])   # tap[:, p] = x[:, p+s]
    return jnp.concatenate(taps, axis=0) * mask           # one multiply, no selects


# ---------------------------------------------------------------------------
# Fused InConv kernel: conv1(h, l) + conv2(h, l) for one image per grid step
# ---------------------------------------------------------------------------
def _inconv_kernel(x_ref, w1h_ref, w1l_ref, w2hh_ref, w2l2_ref, w2hl_ref,
                   bp_ref, bu_ref, mh_ref, ml_ref,
                   b1h_ref, b1l_ref, b2h_ref, b2l_ref,
                   oh_ref, ol_ref, *, H, W, cdt):
    Wl = W // 2
    mh = mh_ref[...]
    ml = ml_ref[...]
    bp = bp_ref[...]

    xc = x_ref[0].astype(cdt)                                        # (CP, Lh)

    # ---- conv1 high: conv3x3 (BN scale folded into weights) -> +bias -> ReLU
    acc1h = jnp.dot(w1h_ref[...], _patch3x3(xc, W, mh),
                    preferred_element_type=jnp.float32)
    y_h = jnp.maximum(acc1h + b1h_ref[...], 0.0)                     # (CP, Lh) f32

    # ---- conv1 low: avg-pool (constant matmul on idle MXU) -> conv -> ReLU
    xp = jnp.dot(xc, bp, preferred_element_type=jnp.float32).astype(cdt)
    acc1l = jnp.dot(w1l_ref[...], _patch3x3(xp, Wl, ml),
                    preferred_element_type=jnp.float32)
    y_l = jnp.maximum(acc1l + b1l_ref[...], 0.0)                     # (CP, Ll) f32

    # ---- conv2: y_h / y_l never touch HBM
    y_hc = y_h.astype(cdt)
    y_lc = y_l.astype(cdt)

    h2h = jnp.dot(w2hh_ref[...], _patch3x3(y_hc, W, mh),
                  preferred_element_type=jnp.float32)                # (CP, Lh)

    # y_l patch built ONCE, consumed by the stacked [l2h; l2l] weight (M = 16)
    ll = jnp.dot(w2l2_ref[...], _patch3x3(y_lc, Wl, ml),
                 preferred_element_type=jnp.float32)                 # (2*CP, Ll)
    l2h, l2l = ll[:CP], ll[CP:]

    yhp = jnp.dot(y_hc, bp, preferred_element_type=jnp.float32).astype(cdt)
    h2l = jnp.dot(w2hl_ref[...], _patch3x3(yhp, Wl, ml),
                  preferred_element_type=jnp.float32)                # (CP, Ll)

    # nearest upsample via constant 0/1 matmul (exact in bf16)
    l2h_up = jnp.dot(l2h.astype(cdt), bu_ref[...],
                     preferred_element_type=jnp.float32)             # (CP, Lh)

    oh_ref[0] = jnp.maximum(h2h + l2h_up + b2h_ref[...], 0.0).astype(oh_ref.dtype)
    ol_ref[0] = jnp.maximum(h2l + l2l + b2l_ref[...], 0.0).astype(ol_ref.dtype)


# ---------------------------------------------------------------------------
# Wrapper-side parameter prep (tiny one-time XLA ops)
# ---------------------------------------------------------------------------
def _prep_weight(w, scale, cdt):
    """HWIO (3,3,cin,cout) * BN scale -> (CP, 9*CP), tap-major / in-channel-minor."""
    kh, kw, cin, cout = w.shape
    w = w * scale[None, None, None, :]                   # fold BN scale into weights
    wp = jnp.zeros((kh, kw, CP, CP), jnp.float32).at[:, :, :cin, :cout].set(w)
    return wp.reshape(kh * kw * CP, CP).T.astype(cdt)


def _bn_fold(bn, eps=1e-5):
    gamma, beta, mean, var = bn
    scale = gamma / jnp.sqrt(var + eps)
    bias = beta - mean * scale
    b = jnp.zeros((CP, 1), jnp.float32).at[:scale.shape[0], 0].set(bias)
    return scale, b


def _pool_up_mats(H, W, cdt):
    """bp (Lh,Ll) = AvgPool2d(2); bu (Ll,Lh) = nearest Upsample(2); 0/0.25/1 entries."""
    P, Pl = H * W, (H // 2) * (W // 2)
    Lh, Ll = _round_up(P, 128), _round_up(Pl, 128)
    pos = jnp.arange(Lh)
    blk = (pos // W // 2) * (W // 2) + (pos % W) // 2
    memb = ((blk[:, None] == jnp.arange(Ll)[None, :]) &
            (pos[:, None] < P)).astype(jnp.float32)      # (Lh, Ll) 0/1
    bp = (memb * 0.25).astype(cdt)                       # avg-pool (0.25 exact in bf16)
    bu = memb.T.astype(cdt)                              # nearest upsample (0/1 exact)
    return bp, bu


def _boundary_mask(H, W, L, cdt):
    """(9*CP, L) 0/1 mask: row block k=(dy+1)*3+(dx+1) validity of tap (dy,dx)."""
    pos = jnp.arange(L)
    yy, xx = pos // W, pos % W
    rows = []
    for dy in (-1, 0, 1):
        for dx in (-1, 0, 1):
            valid = ((yy + dy >= 0) & (yy + dy < H) &
                     (xx + dx >= 0) & (xx + dx < W) & (pos < H * W))
            rows.append(jnp.broadcast_to(valid[None, :], (CP, L)))
    return jnp.concatenate(rows, axis=0).astype(cdt)


# ---------------------------------------------------------------------------
# InConv forward (single fused Pallas call)
# ---------------------------------------------------------------------------
def in_conv_forward(params, x_nchw, compute_dtype=jnp.bfloat16,
                    out_dtype=jnp.float32):
    p = params
    N, cin, H, W = x_nchw.shape
    assert H % 2 == 0 and W % 2 == 0 and W + 1 <= APRON
    c_h = p['w1_h2h'].shape[-1]
    c_l = p['w1_h2l'].shape[-1]
    assert max(cin, c_h, c_l) <= CP
    P, Pl = H * W, (H // 2) * (W // 2)
    Lh, Ll = _round_up(P, 128), _round_up(Pl, 128)
    cdt = compute_dtype

    s1h, b1h = _bn_fold(p['bn1_h'])
    s1l, b1l = _bn_fold(p['bn1_l'])
    s2h, b2h = _bn_fold(p['bn2_h'])
    s2l, b2l = _bn_fold(p['bn2_l'])

    w1h = _prep_weight(p['w1_h2h'], s1h, cdt)
    w1l = _prep_weight(p['w1_h2l'], s1l, cdt)
    w2hh = _prep_weight(p['w2_h2h'], s2h, cdt)
    w2hl = _prep_weight(p['w2_h2l'], s2l, cdt)
    # stacked [l2h; l2l] so the y_l im2col patch is built & multiplied once (M=16)
    w2l2 = jnp.concatenate([_prep_weight(p['w2_l2h'], s2h, cdt),
                            _prep_weight(p['w2_l2l'], s2l, cdt)], axis=0)

    bp, bu = _pool_up_mats(H, W, cdt)
    mh = _boundary_mask(H, W, Lh, cdt)
    ml = _boundary_mask(H // 2, W // 2, Ll, cdt)

    # lane-dense flattened NCHW input; channels zero-padded to CP (no spatial pad)
    x_flat = jnp.zeros((N, CP, Lh), jnp.float32).at[:, :cin, :P].set(
        x_nchw.reshape(N, cin, P))

    batch3 = lambda n: (n, 0, 0)
    const2 = lambda n: (0, 0)
    # TODO(synk): when the row-tiled 512x512 stem lands, mark the grid-invariant
    # operands pipeline_mode=pl.Buffered(1) and use CORE_PARALLEL on the batch
    # axis for v7x; negligible at this problem size.
    cparams = pltpu.CompilerParams(dimension_semantics=("parallel",),
                                   vmem_limit_bytes=32 * 1024 * 1024)

    o_h, o_l = pl.pallas_call(
        functools.partial(_inconv_kernel, H=H, W=W, cdt=cdt),
        out_shape=(jax.ShapeDtypeStruct((N, CP, Lh), out_dtype),
                   jax.ShapeDtypeStruct((N, CP, Ll), out_dtype)),
        grid_spec=pltpu.PrefetchScalarGridSpec(
            num_scalar_prefetch=0, grid=(N,),
            in_specs=[
                pl.BlockSpec((1, CP, Lh), batch3),        # x
                pl.BlockSpec((CP, 9 * CP), const2),       # w1 h->h
                pl.BlockSpec((CP, 9 * CP), const2),       # w1 h->l
                pl.BlockSpec((CP, 9 * CP), const2),       # w2 h->h
                pl.BlockSpec((2 * CP, 9 * CP), const2),   # w2 [l->h ; l->l] stacked
                pl.BlockSpec((CP, 9 * CP), const2),       # w2 h->l
                pl.BlockSpec((Lh, Ll), const2),           # avg-pool matrix
                pl.BlockSpec((Ll, Lh), const2),           # nearest-upsample matrix
                pl.BlockSpec((9 * CP, Lh), const2),       # high-res boundary mask
                pl.BlockSpec((9 * CP, Ll), const2),       # low-res boundary mask
                pl.BlockSpec((CP, 1), const2),            # b1h
                pl.BlockSpec((CP, 1), const2),            # b1l
                pl.BlockSpec((CP, 1), const2),            # b2h
                pl.BlockSpec((CP, 1), const2),            # b2l
            ],
            out_specs=[pl.BlockSpec((1, CP, Lh), batch3),
                       pl.BlockSpec((1, CP, Ll), batch3)]),
        compiler_params=cparams,
    )(x_flat, w1h, w1l, w2hh, w2l2, w2hl, bp, bu, mh, ml, b1h, b1l, b2h, b2l)

    # outputs are already lane-dense flattened NCHW: slice padding, reshape only
    out_h = o_h[:, :c_h, :P].reshape(N, c_h, H, W)
    out_l = o_l[:, :c_l, :Pl].reshape(N, c_l, H // 2, W // 2)
    return out_h, out_l


# ---------------------------------------------------------------------------
# Parameter init (matches the PyTorch module layout)
# ---------------------------------------------------------------------------
def init_params(key, in_ch, out_ch):
    c_l = int(0.25 * out_ch)
    c_h = out_ch - c_l
    keys = jax.random.split(key, 10)

    def conv_w(k, cin, cout):
        return jax.random.normal(k, (3, 3, cin, cout), jnp.float32) / jnp.sqrt(9.0 * cin)

    def bn(k, c):
        k1, k2 = jax.random.split(k)
        gamma = 1.0 + 0.1 * jax.random.normal(k1, (c,), jnp.float32)
        beta = 0.1 * jax.random.normal(k2, (c,), jnp.float32)
        return gamma, beta, jnp.zeros((c,), jnp.float32), jnp.ones((c,), jnp.float32)

    return dict(
        w1_h2h=conv_w(keys[0], in_ch, c_h), w1_h2l=conv_w(keys[1], in_ch, c_l),
        bn1_h=bn(keys[2], c_h), bn1_l=bn(keys[3], c_l),
        w2_h2h=conv_w(keys[4], c_h, c_h), w2_h2l=conv_w(keys[5], c_h, c_l),
        w2_l2h=conv_w(keys[6], c_l, c_h), w2_l2l=conv_w(keys[7], c_l, c_l),
        bn2_h=bn(keys[8], c_h), bn2_l=bn(keys[9], c_l),
    )


# ---------------------------------------------------------------------------
# Pure-JAX (lax.conv) reference for correctness checking
# ---------------------------------------------------------------------------
def _ref_conv(x, w):
    return jax.lax.conv_general_dilated(
        x, w, (1, 1), 'SAME', dimension_numbers=('NCHW', 'HWIO', 'NCHW'))


def _ref_pool(x):
    N, C, H, W = x.shape
    return x.reshape(N, C, H // 2, 2, W // 2, 2).mean(axis=(3, 5))


def _ref_up(x):
    return jnp.repeat(jnp.repeat(x, 2, axis=2), 2, axis=3)


def _ref_bn_relu(y, bnp):
    gamma, beta, mean, var = bnp
    s = gamma / jnp.sqrt(var + 1e-5)
    b = beta - mean * s
    return jnp.maximum(y * s[None, :, None, None] + b[None, :, None, None], 0.0)


def in_conv_reference(params, x):
    p = params
    x_h = _ref_bn_relu(_ref_conv(x, p['w1_h2h']), p['bn1_h'])
    x_l = _ref_bn_relu(_ref_conv(_ref_pool(x), p['w1_h2l']), p['bn1_l'])
    h2h = _ref_conv(x_h, p['w2_h2h'])
    h2l = _ref_conv(_ref_pool(x_h), p['w2_h2l'])
    l2l = _ref_conv(x_l, p['w2_l2l'])
    l2h = _ref_up(_ref_conv(x_l, p['w2_l2h']))
    out_h = _ref_bn_relu(h2h + l2h, p['bn2_h'])
    out_l = _ref_bn_relu(h2l + l2l, p['bn2_l'])
    return out_h, out_l


if __name__ == "__main__":
    key = jax.random.PRNGKey(0)
    in_ch, out_ch = 4, 8          # octave split: C_l = 2, C_h = 6
    N, H, W = 2, 16, 16
    kx, kp = jax.random.split(key)
    x = jax.random.normal(kx, (N, in_ch, H, W), jnp.float32)   # PyTorch NCHW input
    params = init_params(kp, in_ch, out_ch)

    ref_h, ref_l = in_conv_reference(params, x)

    # strict check: f32 compute path
    f32_h, f32_l = in_conv_forward(params, x, compute_dtype=jnp.float32)
    jax.block_until_ready((f32_h, f32_l))
    assert f32_h.shape == (N, out_ch - int(0.25 * out_ch), H, W)
    assert f32_l.shape == (N, int(0.25 * out_ch), H // 2, W // 2)
    assert jnp.allclose(f32_h, ref_h, atol=1e-4, rtol=1e-4)
    assert jnp.allclose(f32_l, ref_l, atol=1e-4, rtol=1e-4)

    # fast path: bf16 MXU inputs / bf16 patch construction, f32 accumulation
    bf_h, bf_l = in_conv_forward(params, x, compute_dtype=jnp.bfloat16)
    jax.block_until_ready((bf_h, bf_l))
    assert jnp.allclose(bf_h, ref_h, atol=1e-1, rtol=5e-2)
    assert jnp.allclose(bf_l, ref_l, atol=1e-1, rtol=5e-2)

    print("KERNEL_OK")
</pallas_src>

<mosaic_0001>
module attributes {stable_mosaic.version = 11 : i64} {
  func.func @_inconv_kernel(%arg0: i32, %arg1: memref<1x8x256xf32, #tpu.memory_space<vmem>>, %arg2: memref<8x72xf32, #tpu.memory_space<vmem>>, %arg3: memref<8x72xf32, #tpu.memory_space<vmem>>, %arg4: memref<8x72xf32, #tpu.memory_space<vmem>>, %arg5: memref<16x72xf32, #tpu.memory_space<vmem>>, %arg6: memref<8x72xf32, #tpu.memory_space<vmem>>, %arg7: memref<256x128xf32, #tpu.memory_space<vmem>>, %arg8: memref<128x256xf32, #tpu.memory_space<vmem>>, %arg9: memref<72x256xf32, #tpu.memory_space<vmem>>, %arg10: memref<72x128xf32, #tpu.memory_space<vmem>>, %arg11: memref<8x1xf32, #tpu.memory_space<vmem>>, %arg12: memref<8x1xf32, #tpu.memory_space<vmem>>, %arg13: memref<8x1xf32, #tpu.memory_space<vmem>>, %arg14: memref<8x1xf32, #tpu.memory_space<vmem>>, %arg15: memref<1x8x256xf32, #tpu.memory_space<vmem>>, %arg16: memref<1x8x128xf32, #tpu.memory_space<vmem>>) attributes {dimension_semantics = [#tpu.dimension_semantics<parallel>], iteration_bounds = array<i64: 2>, scalar_prefetch = 0 : i64, scratch_operands = 0 : i64, tpu.core_type = #tpu.core_type<tc>, window_params = [{transform_indices = @transform_0, window_bounds = array<i64: 1, 8, 256>}, {pipeline_mode = #tpu.pipeline_mode<synchronous>, transform_indices = @transform_1, window_bounds = array<i64: 8, 72>}, {pipeline_mode = #tpu.pipeline_mode<synchronous>, transform_indices = @transform_2, window_bounds = array<i64: 8, 72>}, {pipeline_mode = #tpu.pipeline_mode<synchronous>, transform_indices = @transform_3, window_bounds = array<i64: 8, 72>}, {pipeline_mode = #tpu.pipeline_mode<synchronous>, transform_indices = @transform_4, window_bounds = array<i64: 16, 72>}, {pipeline_mode = #tpu.pipeline_mode<synchronous>, transform_indices = @transform_5, window_bounds = array<i64: 8, 72>}, {pipeline_mode = #tpu.pipeline_mode<synchronous>, transform_indices = @transform_6, window_bounds = array<i64: 256, 128>}, {pipeline_mode = #tpu.pipeline_mode<synchronous>, transform_indices = @transform_7, window_bounds = array<i64: 128, 256>}, {pipeline_mode = #tpu.pipeline_mode<synchronous>, transform_indices = @transform_8, window_bounds = array<i64: 72, 256>}, {pipeline_mode = #tpu.pipeline_mode<synchronous>, transform_indices = @transform_9, window_bounds = array<i64: 72, 128>}, {pipeline_mode = #tpu.pipeline_mode<synchronous>, transform_indices = @transform_10, window_bounds = array<i64: 8, 1>}, {pipeline_mode = #tpu.pipeline_mode<synchronous>, transform_indices = @transform_11, window_bounds = array<i64: 8, 1>}, {pipeline_mode = #tpu.pipeline_mode<synchronous>, transform_indices = @transform_12, window_bounds = array<i64: 8, 1>}, {pipeline_mode = #tpu.pipeline_mode<synchronous>, transform_indices = @transform_13, window_bounds = array<i64: 8, 1>}, {transform_indices = @transform_14, window_bounds = array<i64: 1, 8, 256>}, {transform_indices = @transform_15, window_bounds = array<i64: 1, 8, 128>}]} {
    %c0 = arith.constant 0 : index
    %c0_0 = arith.constant 0 : index
    %0 = vector.load %arg9[%c0, %c0_0] : memref<72x256xf32, #tpu.memory_space<vmem>>, vector<72x256xf32>
    %c0_1 = arith.constant 0 : index
    %c0_2 = arith.constant 0 : index
    %1 = vector.load %arg10[%c0_1, %c0_2] : memref<72x128xf32, #tpu.memory_space<vmem>>, vector<72x128xf32>
    %c0_3 = arith.constant 0 : index
    %c0_4 = arith.constant 0 : index
    %2 = vector.load %arg7[%c0_3, %c0_4] : memref<256x128xf32, #tpu.memory_space<vmem>>, vector<256x128xf32>
    %c0_5 = arith.constant 0 : index
    %c0_6 = arith.constant 0 : index
    %c0_7 = arith.constant 0 : index
    %3 = vector.load %arg1[%c0_5, %c0_6, %c0_7] : memref<1x8x256xf32, #tpu.memory_space<vmem>>, vector<1x8x256xf32>
    %4 = vector.shape_cast %3 : vector<1x8x256xf32> to vector<8x256xf32>
    %c0_8 = arith.constant 0 : index
    %c0_9 = arith.constant 0 : index
    %5 = vector.load %arg2[%c0_8, %c0_9] : memref<8x72xf32, #tpu.memory_space<vmem>>, vector<8x72xf32>
    %cst = arith.constant 0.000000e+00 : f32
    %6 = vector.broadcast %cst : f32 to vector<8x128xf32>
    %7 = tpu.concatenate %6, %4, %6 in 1 : vector<8x128xf32>, vector<8x256xf32>, vector<8x128xf32> -> vector<8x512xf32>
    %8 = vector.extract_strided_slice %7 {offsets = [0, 111], sizes = [8, 256], strides = [1, 1]} : vector<8x512xf32> to vector<8x256xf32>
    %9 = vector.extract_strided_slice %7 {offsets = [0, 112], sizes = [8, 256], strides = [1, 1]} : vector<8x512xf32> to vector<8x256xf32>
    %10 = vector.extract_strided_slice %7 {offsets = [0, 113], sizes = [8, 256], strides = [1, 1]} : vector<8x512xf32> to vector<8x256xf32>
    %11 = vector.extract_strided_slice %7 {offsets = [0, 127], sizes = [8, 256], strides = [1, 1]} : vector<8x512xf32> to vector<8x256xf32>
    %12 = vector.extract_strided_slice %7 {offsets = [0, 128], sizes = [8, 256], strides = [1, 1]} : vector<8x512xf32> to vector<8x256xf32>
    %13 = vector.extract_strided_slice %7 {offsets = [0, 129], sizes = [8, 256], strides = [1, 1]} : vector<8x512xf32> to vector<8x256xf32>
    %14 = vector.extract_strided_slice %7 {offsets = [0, 143], sizes = [8, 256], strides = [1, 1]} : vector<8x512xf32> to vector<8x256xf32>
    %15 = vector.extract_strided_slice %7 {offsets = [0, 144], sizes = [8, 256], strides = [1, 1]} : vector<8x512xf32> to vector<8x256xf32>
    %16 = vector.extract_strided_slice %7 {offsets = [0, 145], sizes = [8, 256], strides = [1, 1]} : vector<8x512xf32> to vector<8x256xf32>
    %17 = tpu.concatenate %8, %9, %10, %11, %12, %13, %14, %15, %16 in 0 : vector<8x256xf32>, vector<8x256xf32>, vector<8x256xf32>, vector<8x256xf32>, vector<8x256xf32>, vector<8x256xf32>, vector<8x256xf32>, vector<8x256xf32>, vector<8x256xf32> -> vector<72x256xf32>
    %18 = arith.mulf %17, %0 : vector<72x256xf32>
    %cst_10 = arith.constant dense<0.000000e+00> : vector<8x256xf32>
    %19 = tpu.matmul %5, %18, %cst_10 {dimension_numbers = #tpu.dot_dimension_numbers<[1], [0], [0], [1], [0, 0, 1, 1], [], []>} : vector<8x72xf32>, vector<72x256xf32>, vector<8x256xf32> -> vector<8x256xf32>
    %c0_11 = arith.constant 0 : index
    %c0_12 = arith.constant 0 : index
    %20 = vector.load %arg11[%c0_11, %c0_12] : memref<8x1xf32, #tpu.memory_space<vmem>>, vector<8x1xf32>
    %21 = vector.broadcast %20 : vector<8x1xf32> to vector<8x256xf32>
    %22 = arith.addf %19, %21 : vector<8x256xf32>
    %cst_13 = arith.constant 0.000000e+00 : f32
    %23 = vector.broadcast %cst_13 : f32 to vector<8x256xf32>
    %24 = arith.maximumf %22, %23 : vector<8x256xf32>
    %cst_14 = arith.constant dense<0.000000e+00> : vector<8x128xf32>
    %25 = tpu.matmul %4, %2, %cst_14 {dimension_numbers = #tpu.dot_dimension_numbers<[1], [0], [0], [1], [0, 0, 1, 1], [], []>} : vector<8x256xf32>, vector<256x128xf32>, vector<8x128xf32> -> vector<8x128xf32>
    %c0_15 = arith.constant 0 : index
    %c0_16 = arith.constant 0 : index
    %26 = vector.load %arg3[%c0_15, %c0_16] : memref<8x72xf32, #tpu.memory_space<vmem>>, vector<8x72xf32>
    %cst_17 = arith.constant 0.000000e+00 : f32
    %27 = vector.broadcast %cst_17 : f32 to vector<8x128xf32>
    %28 = tpu.concatenate %27, %25, %27 in 1 : vector<8x128xf32>, vector<8x128xf32>, vector<8x128xf32> -> vector<8x384xf32>
    %29 = vector.extract_strided_slice %28 {offsets = [0, 119], sizes = [8, 128], strides = [1, 1]} : vector<8x384xf32> to vector<8x128xf32>
    %30 = vector.extract_strided_slice %28 {offsets = [0, 120], sizes = [8, 128], strides = [1, 1]} : vector<8x384xf32> to vector<8x128xf32>
    %31 = vector.extract_strided_slice %28 {offsets = [0, 121], sizes = [8, 128], strides = [1, 1]} : vector<8x384xf32> to vector<8x128xf32>
    %32 = vector.extract_strided_slice %28 {offsets = [0, 127], sizes = [8, 128], strides = [1, 1]} : vector<8x384xf32> to vector<8x128xf32>
    %33 = vector.extract_strided_slice %28 {offsets = [0, 128], sizes = [8, 128], strides = [1, 1]} : vector<8x384xf32> to vector<8x128xf32>
    %34 = vector.extract_strided_slice %28 {offsets = [0, 129], sizes = [8, 128], strides = [1, 1]} : vector<8x384xf32> to vector<8x128xf32>
    %35 = vector.extract_strided_slice %28 {offsets = [0, 135], sizes = [8, 128], strides = [1, 1]} : vector<8x384xf32> to vector<8x128xf32>
    %36 = vector.extract_strided_slice %28 {offsets = [0, 136], sizes = [8, 128], strides = [1, 1]} : vector<8x384xf32> to vector<8x128xf32>
    %37 = vector.extract_strided_slice %28 {offsets = [0, 137], sizes = [8, 128], strides = [1, 1]} : vector<8x384xf32> to vector<8x128xf32>
    %38 = tpu.concatenate %29, %30, %31, %32, %33, %34, %35, %36, %37 in 0 : vector<8x128xf32>, vector<8x128xf32>, vector<8x128xf32>, vector<8x128xf32>, vector<8x128xf32>, vector<8x128xf32>, vector<8x128xf32>, vector<8x128xf32>, vector<8x128xf32> -> vector<72x128xf32>
    %39 = arith.mulf %38, %1 : vector<72x128xf32>
    %cst_18 = arith.constant dense<0.000000e+00> : vector<8x128xf32>
    %40 = tpu.matmul %26, %39, %cst_18 {dimension_numbers = #tpu.dot_dimension_numbers<[1], [0], [0], [1], [0, 0, 1, 1], [], []>} : vector<8x72xf32>, vector<72x128xf32>, vector<8x128xf32> -> vector<8x128xf32>
    %c0_19 = arith.constant 0 : index
    %c0_20 = arith.constant 0 : index
    %41 = vector.load %arg12[%c0_19, %c0_20] : memref<8x1xf32, #tpu.memory_space<vmem>>, vector<8x1xf32>
    %42 = vector.broadcast %41 : vector<8x1xf32> to vector<8x128xf32>
    %43 = arith.addf %40, %42 : vector<8x128xf32>
    %cst_21 = arith.constant 0.000000e+00 : f32
    %44 = vector.broadcast %cst_21 : f32 to vector<8x128xf32>
    %45 = arith.maximumf %43, %44 : vector<8x128xf32>
    %c0_22 = arith.constant 0 : index
    %c0_23 = arith.constant 0 : index
    %46 = vector.load %arg4[%c0_22, %c0_23] : memref<8x72xf32, #tpu.memory_space<vmem>>, vector<8x72xf32>
    %cst_24 = arith.constant 0.000000e+00 : f32
    %47 = vector.broadcast %cst_24 : f32 to vector<8x128xf32>
    %48 = tpu.concatenate %47, %24, %47 in 1 : vector<8x128xf32>, vector<8x256xf32>, vector<8x128xf32> -> vector<8x512xf32>
    %49 = vector.extract_strided_slice %48 {offsets = [0, 111], sizes = [8, 256], strides = [1, 1]} : vector<8x512xf32> to vector<8x256xf32>
    %50 = vector.extract_strided_slice %48 {offsets = [0, 112], sizes = [8, 256], strides = [1, 1]} : vector<8x512xf32> to vector<8x256xf32>
    %51 = vector.extract_strided_slice %48 {offsets = [0, 113], sizes = [8, 256], strides = [1, 1]} : vector<8x512xf32> to vector<8x256xf32>
    %52 = vector.extract_strided_slice %48 {offsets = [0, 127], sizes = [8, 256], strides = [1, 1]} : vector<8x512xf32> to vector<8x256xf32>
    %53 = vector.extract_strided_slice %48 {offsets = [0, 128], sizes = [8, 256], strides = [1, 1]} : vector<8x512xf32> to vector<8x256xf32>
    %54 = vector.extract_strided_slice %48 {offsets = [0, 129], sizes = [8, 256], strides = [1, 1]} : vector<8x512xf32> to vector<8x256xf32>
    %55 = vector.extract_strided_slice %48 {offsets = [0, 143], sizes = [8, 256], strides = [1, 1]} : vector<8x512xf32> to vector<8x256xf32>
    %56 = vector.extract_strided_slice %48 {offsets = [0, 144], sizes = [8, 256], strides = [1, 1]} : vector<8x512xf32> to vector<8x256xf32>
    %57 = vector.extract_strided_slice %48 {offsets = [0, 145], sizes = [8, 256], strides = [1, 1]} : vector<8x512xf32> to vector<8x256xf32>
    %58 = tpu.concatenate %49, %50, %51, %52, %53, %54, %55, %56, %57 in 0 : vector<8x256xf32>, vector<8x256xf32>, vector<8x256xf32>, vector<8x256xf32>, vector<8x256xf32>, vector<8x256xf32>, vector<8x256xf32>, vector<8x256xf32>, vector<8x256xf32> -> vector<72x256xf32>
    %59 = arith.mulf %58, %0 : vector<72x256xf32>
    %cst_25 = arith.constant dense<0.000000e+00> : vector<8x256xf32>
    %60 = tpu.matmul %46, %59, %cst_25 {dimension_numbers = #tpu.dot_dimension_numbers<[1], [0], [0], [1], [0, 0, 1, 1], [], []>} : vector<8x72xf32>, vector<72x256xf32>, vector<8x256xf32> -> vector<8x256xf32>
    %c0_26 = arith.constant 0 : index
    %c0_27 = arith.constant 0 : index
    %61 = vector.load %arg5[%c0_26, %c0_27] : memref<16x72xf32, #tpu.memory_space<vmem>>, vector<16x72xf32>
    %cst_28 = arith.constant 0.000000e+00 : f32
    %62 = vector.broadcast %cst_28 : f32 to vector<8x128xf32>
    %63 = tpu.concatenate %62, %45, %62 in 1 : vector<8x128xf32>, vector<8x128xf32>, vector<8x128xf32> -> vector<8x384xf32>
    %64 = vector.extract_strided_slice %63 {offsets = [0, 119], sizes = [8, 128], strides = [1, 1]} : vector<8x384xf32> to vector<8x128xf32>
    %65 = vector.extract_strided_slice %63 {offsets = [0, 120], sizes = [8, 128], strides = [1, 1]} : vector<8x384xf32> to vector<8x128xf32>
    %66 = vector.extract_strided_slice %63 {offsets = [0, 121], sizes = [8, 128], strides = [1, 1]} : vector<8x384xf32> to vector<8x128xf32>
    %67 = vector.extract_strided_slice %63 {offsets = [0, 127], sizes = [8, 128], strides = [1, 1]} : vector<8x384xf32> to vector<8x128xf32>
    %68 = vector.extract_strided_slice %63 {offsets = [0, 128], sizes = [8, 128], strides = [1, 1]} : vector<8x384xf32> to vector<8x128xf32>
    %69 = vector.extract_strided_slice %63 {offsets = [0, 129], sizes = [8, 128], strides = [1, 1]} : vector<8x384xf32> to vector<8x128xf32>
    %70 = vector.extract_strided_slice %63 {offsets = [0, 135], sizes = [8, 128], strides = [1, 1]} : vector<8x384xf32> to vector<8x128xf32>
    %71 = vector.extract_strided_slice %63 {offsets = [0, 136], sizes = [8, 128], strides = [1, 1]} : vector<8x384xf32> to vector<8x128xf32>
    %72 = vector.extract_strided_slice %63 {offsets = [0, 137], sizes = [8, 128], strides = [1, 1]} : vector<8x384xf32> to vector<8x128xf32>
    %73 = tpu.concatenate %64, %65, %66, %67, %68, %69, %70, %71, %72 in 0 : vector<8x128xf32>, vector<8x128xf32>, vector<8x128xf32>, vector<8x128xf32>, vector<8x128xf32>, vector<8x128xf32>, vector<8x128xf32>, vector<8x128xf32>, vector<8x128xf32> -> vector<72x128xf32>
    %74 = arith.mulf %73, %1 : vector<72x128xf32>
    %cst_29 = arith.constant dense<0.000000e+00> : vector<16x128xf32>
    %75 = tpu.matmul %61, %74, %cst_29 {dimension_numbers = #tpu.dot_dimension_numbers<[1], [0], [0], [1], [0, 0, 1, 1], [], []>} : vector<16x72xf32>, vector<72x128xf32>, vector<16x128xf32> -> vector<16x128xf32>
    %76 = vector.extract_strided_slice %75 {offsets = [0, 0], sizes = [8, 128], strides = [1, 1]} : vector<16x128xf32> to vector<8x128xf32>
    %77 = vector.extract_strided_slice %75 {offsets = [8, 0], sizes = [8, 128], strides = [1, 1]} : vector<16x128xf32> to vector<8x128xf32>
    %cst_30 = arith.constant dense<0.000000e+00> : vector<8x128xf32>
    %78 = tpu.matmul %24, %2, %cst_30 {dimension_numbers = #tpu.dot_dimension_numbers<[1], [0], [0], [1], [0, 0, 1, 1], [], []>} : vector<8x256xf32>, vector<256x128xf32>, vector<8x128xf32> -> vector<8x128xf32>
    %c0_31 = arith.constant 0 : index
    %c0_32 = arith.constant 0 : index
    %79 = vector.load %arg6[%c0_31, %c0_32] : memref<8x72xf32, #tpu.memory_space<vmem>>, vector<8x72xf32>
    %cst_33 = arith.constant 0.000000e+00 : f32
    %80 = vector.broadcast %cst_33 : f32 to vector<8x128xf32>
    %81 = tpu.concatenate %80, %78, %80 in 1 : vector<8x128xf32>, vector<8x128xf32>, vector<8x128xf32> -> vector<8x384xf32>
    %82 = vector.extract_strided_slice %81 {offsets = [0, 119], sizes = [8, 128], strides = [1, 1]} : vector<8x384xf32> to vector<8x128xf32>
    %83 = vector.extract_strided_slice %81 {offsets = [0, 120], sizes = [8, 128], strides = [1, 1]} : vector<8x384xf32> to vector<8x128xf32>
    %84 = vector.extract_strided_slice %81 {offsets = [0, 121], sizes = [8, 128], strides = [1, 1]} : vector<8x384xf32> to vector<8x128xf32>
    %85 = vector.extract_strided_slice %81 {offsets = [0, 127], sizes = [8, 128], strides = [1, 1]} : vector<8x384xf32> to vector<8x128xf32>
    %86 = vector.extract_strided_slice %81 {offsets = [0, 128], sizes = [8, 128], strides = [1, 1]} : vector<8x384xf32> to vector<8x128xf32>
    %87 = vector.extract_strided_slice %81 {offsets = [0, 129], sizes = [8, 128], strides = [1, 1]} : vector<8x384xf32> to vector<8x128xf32>
    %88 = vector.extract_strided_slice %81 {offsets = [0, 135], sizes = [8, 128], strides = [1, 1]} : vector<8x384xf32> to vector<8x128xf32>
    %89 = vector.extract_strided_slice %81 {offsets = [0, 136], sizes = [8, 128], strides = [1, 1]} : vector<8x384xf32> to vector<8x128xf32>
    %90 = vector.extract_strided_slice %81 {offsets = [0, 137], sizes = [8, 128], strides = [1, 1]} : vector<8x384xf32> to vector<8x128xf32>
    %91 = tpu.concatenate %82, %83, %84, %85, %86, %87, %88, %89, %90 in 0 : vector<8x128xf32>, vector<8x128xf32>, vector<8x128xf32>, vector<8x128xf32>, vector<8x128xf32>, vector<8x128xf32>, vector<8x128xf32>, vector<8x128xf32>, vector<8x128xf32> -> vector<72x128xf32>
    %92 = arith.mulf %91, %1 : vector<72x128xf32>
    %cst_34 = arith.constant dense<0.000000e+00> : vector<8x128xf32>
    %93 = tpu.matmul %79, %92, %cst_34 {dimension_numbers = #tpu.dot_dimension_numbers<[1], [0], [0], [1], [0, 0, 1, 1], [], []>} : vector<8x72xf32>, vector<72x128xf32>, vector<8x128xf32> -> vector<8x128xf32>
    %c0_35 = arith.constant 0 : index
    %c0_36 = arith.constant 0 : index
    %94 = vector.load %arg8[%c0_35, %c0_36] : memref<128x256xf32, #tpu.memory_space<vmem>>, vector<128x256xf32>
    %cst_37 = arith.constant dense<0.000000e+00> : vector<8x256xf32>
    %95 = tpu.matmul %76, %94, %cst_37 {dimension_numbers = #tpu.dot_dimension_numbers<[1], [0], [0], [1], [0, 0, 1, 1], [], []>} : vector<8x128xf32>, vector<128x256xf32>, vector<8x256xf32> -> vector<8x256xf32>
    %96 = arith.addf %60, %95 : vector<8x256xf32>
    %c0_38 = arith.constant 0 : index
    %c0_39 = arith.constant 0 : index
    %97 = vector.load %arg13[%c0_38, %c0_39] : memref<8x1xf32, #tpu.memory_space<vmem>>, vector<8x1xf32>
    %98 = vector.broadcast %97 : vector<8x1xf32> to vector<8x256xf32>
    %99 = arith.addf %96, %98 : vector<8x256xf32>
    %cst_40 = arith.constant 0.000000e+00 : f32
    %100 = vector.broadcast %cst_40 : f32 to vector<8x256xf32>
    %101 = arith.maximumf %99, %100 : vector<8x256xf32>
    %c0_41 = arith.constant 0 : index
    %c0_42 = arith.constant 0 : index
    %c0_43 = arith.constant 0 : index
    %102 = vector.load %arg15[%c0_41, %c0_42, %c0_43] : memref<1x8x256xf32, #tpu.memory_space<vmem>>, vector<1x8x256xf32>
    %103 = vector.shape_cast %102 : vector<1x8x256xf32> to vector<8x256xf32>
    %104 = vector.shape_cast %101 : vector<8x256xf32> to vector<1x8x256xf32>
    tpu.vector_store %arg15[%c0_41, %c0_42, %c0_43], %104 {strides = array<i32>} : memref<1x8x256xf32, #tpu.memory_space<vmem>>, vector<1x8x256xf32>,
    %105 = arith.addf %93, %77 : vector<8x128xf32>
    %c0_44 = arith.constant 0 : index
    %c0_45 = arith.constant 0 : index
    %106 = vector.load %arg14[%c0_44, %c0_45] : memref<8x1xf32, #tpu.memory_space<vmem>>, vector<8x1xf32>
    %107 = vector.broadcast %106 : vector<8x1xf32> to vector<8x128xf32>
    %108 = arith.addf %105, %107 : vector<8x128xf32>
    %cst_46 = arith.constant 0.000000e+00 : f32
    %109 = vector.broadcast %cst_46 : f32 to vector<8x128xf32>
    %110 = arith.maximumf %108, %109 : vector<8x128xf32>
    %c0_47 = arith.constant 0 : index
    %c0_48 = arith.constant 0 : index
    %c0_49 = arith.constant 0 : index
    %111 = vector.load %arg16[%c0_47, %c0_48, %c0_49] : memref<1x8x128xf32, #tpu.memory_space<vmem>>, vector<1x8x128xf32>
    %112 = vector.shape_cast %111 : vector<1x8x128xf32> to vector<8x128xf32>
    %113 = vector.shape_cast %110 : vector<8x128xf32> to vector<1x8x128xf32>
    tpu.vector_store %arg16[%c0_47, %c0_48, %c0_49], %113 {strides = array<i32>} : memref<1x8x128xf32, #tpu.memory_space<vmem>>, vector<1x8x128xf32>,
    return
  }
  func.func @transform_0(%arg0: i32) -> (i32, i32, i32) {
    %c0_i32 = arith.constant 0 : i32
    %c0_i32_0 = arith.constant 0 : i32
    %c0_i32_1 = arith.constant 0 : i32
    return %arg0, %c0_i32, %c0_i32_0 : i32, i32, i32
  }
  func.func @transform_1(%arg0: i32) -> (i32, i32) {
    %c0_i32 = arith.constant 0 : i32
    %c0_i32_0 = arith.constant 0 : i32
    %c0_i32_1 = arith.constant 0 : i32
    return %c0_i32, %c0_i32_0 : i32, i32
  }
  func.func @transform_2(%arg0: i32) -> (i32, i32) {
    %c0_i32 = arith.constant 0 : i32
    %c0_i32_0 = arith.constant 0 : i32
    %c0_i32_1 = arith.constant 0 : i32
    return %c0_i32, %c0_i32_0 : i32, i32
  }
  func.func @transform_3(%arg0: i32) -> (i32, i32) {
    %c0_i32 = arith.constant 0 : i32
    %c0_i32_0 = arith.constant 0 : i32
    %c0_i32_1 = arith.constant 0 : i32
    return %c0_i32, %c0_i32_0 : i32, i32
  }
  func.func @transform_4(%arg0: i32) -> (i32, i32) {
    %c0_i32 = arith.constant 0 : i32
    %c0_i32_0 = arith.constant 0 : i32
    %c0_i32_1 = arith.constant 0 : i32
    return %c0_i32, %c0_i32_0 : i32, i32
  }
  func.func @transform_5(%arg0: i32) -> (i32, i32) {
    %c0_i32 = arith.constant 0 : i32
    %c0_i32_0 = arith.constant 0 : i32
    %c0_i32_1 = arith.constant 0 : i32
    return %c0_i32, %c0_i32_0 : i32, i32
  }
  func.func @transform_6(%arg0: i32) -> (i32, i32) {
    %c0_i32 = arith.constant 0 : i32
    %c0_i32_0 = arith.constant 0 : i32
    %c0_i32_1 = arith.constant 0 : i32
    return %c0_i32, %c0_i32_0 : i32, i32
  }
  func.func @transform_7(%arg0: i32) -> (i32, i32) {
    %c0_i32 = arith.constant 0 : i32
    %c0_i32_0 = arith.constant 0 : i32
    %c0_i32_1 = arith.constant 0 : i32
    return %c0_i32, %c0_i32_0 : i32, i32
  }
  func.func @transform_8(%arg0: i32) -> (i32, i32) {
    %c0_i32 = arith.constant 0 : i32
    %c0_i32_0 = arith.constant 0 : i32
    %c0_i32_1 = arith.constant 0 : i32
    return %c0_i32, %c0_i32_0 : i32, i32
  }
  func.func @transform_9(%arg0: i32) -> (i32, i32) {
    %c0_i32 = arith.constant 0 : i32
    %c0_i32_0 = arith.constant 0 : i32
    %c0_i32_1 = arith.constant 0 : i32
    return %c0_i32, %c0_i32_0 : i32, i32
  }
  func.func @transform_10(%arg0: i32) -> (i32, i32) {
    %c0_i32 = arith.constant 0 : i32
    %c0_i32_0 = arith.constant 0 : i32
    %c0_i32_1 = arith.constant 0 : i32
    return %c0_i32, %c0_i32_0 : i32, i32
  }
  func.func @transform_11(%arg0: i32) -> (i32, i32) {
    %c0_i32 = arith.constant 0 : i32
    %c0_i32_0 = arith.constant 0 : i32
    %c0_i32_1 = arith.constant 0 : i32
    return %c0_i32, %c0_i32_0 : i32, i32
  }
  func.func @transform_12(%arg0: i32) -> (i32, i32) {
    %c0_i32 = arith.constant 0 : i32
    %c0_i32_0 = arith.constant 0 : i32
    %c0_i32_1 = arith.constant 0 : i32
    return %c0_i32, %c0_i32_0 : i32, i32
  }
  func.func @transform_13(%arg0: i32) -> (i32, i32) {
    %c0_i32 = arith.constant 0 : i32
    %c0_i32_0 = arith.constant 0 : i32
    %c0_i32_1 = arith.constant 0 : i32
    return %c0_i32, %c0_i32_0 : i32, i32
  }
  func.func @transform_14(%arg0: i32) -> (i32, i32, i32) {
    %c0_i32 = arith.constant 0 : i32
    %c0_i32_0 = arith.constant 0 : i32
    %c0_i32_1 = arith.constant 0 : i32
    return %arg0, %c0_i32, %c0_i32_0 : i32, i32, i32
  }
  func.func @transform_15(%arg0: i32) -> (i32, i32, i32) {
    %c0_i32 = arith.constant 0 : i32
    %c0_i32_0 = arith.constant 0 : i32
    %c0_i32_1 = arith.constant 0 : i32
    return %arg0, %c0_i32, %c0_i32_0 : i32, i32, i32
  }
}

</mosaic_0001>

<bundles_post_ra>
// kernel: tpu_custom_call.1
= control target key start
LH: loop header
LB: loop body
LE: loop exit
PB: predicated region body
PF: predicated region fallthrough
CT: control target
= control target key end

     0   :  { %s4380_s0 = inlined_call_operand.vmem [shape: f32[2,8,256], index: 0, kind: input, shape index: {}]   ;;  %s4381_s1 = inlined_call_operand.hbm [shape: f32[8,72], index: 1, kind: input, shape index: {}]   ;;  %s4382_s2 = inlined_call_operand.hbm [shape: f32[8,72], index: 2, kind: input, shape index: {}]   ;;  %s4383_s3 = inlined_call_operand.vmem [shape: f32[8,72], index: 3, kind: input, shape index: {}]   ;;  %s4384_s4 = inlined_call_operand.hbm [shape: f32[16,72], index: 4, kind: input, shape index: {}]   ;;  %s4385_s5 = inlined_call_operand.hbm [shape: f32[8,72], index: 5, kind: input, shape index: {}]   ;;  %s4386_s6 = inlined_call_operand.hbm [shape: f32[256,128], index: 6, kind: input, shape index: {}]   ;;  %s4387_s7 = inlined_call_operand.hbm [shape: f32[128,256], index: 7, kind: input, shape index: {}]   ;;  %s4388_s8 = inlined_call_operand.hbm [shape: f32[72,256], index: 8, kind: input, shape index: {}]   ;;  %s4389_s9 = inlined_call_operand.hbm [shape: f32[72,128], index: 9, kind: input, shape index: {}]   ;;  %s4390_s10 = inlined_call_operand.vmem [shape: f32[8,1], index: 10, kind: input, shape index: {}]   ;;  %s4391_s11 = inlined_call_operand.vmem [shape: f32[8,1], index: 11, kind: input, shape index: {}]   ;;  %s4392_s12 = inlined_call_operand.vmem [shape: f32[8,1], index: 12, kind: input, shape index: {}]   ;;  %s4393_s13 = inlined_call_operand.vmem [shape: f32[8,1], index: 13, kind: input, shape index: {}]   ;;  %s4394_s14 = inlined_call_operand.hbm [shape: f32[2,8,256], index: 14, kind: output, shape index: {0}]   ;;  %s4395_s15 = inlined_call_operand.hbm [shape: f32[2,8,128], index: 15, kind: output, shape index: {1}]  }
   0x1   :  { %4448 = sst [smem:[#allocation66_spill]] %s4382_s2 }
   0x2   :  { %4449 = sst [smem:[#allocation67_spill]] %s4385_s5 }
   0x3   :  { %21 = vsyncpa [#allocation3], 0 }
   0x4   :  { %22 = vsyncpa [#allocation6], 0 }
   0x5   :  { %23 = vsyncpa [#allocation9], 0 }
   0x6   :  { %24 = vsyncpa [#allocation12], 0 }
   0x7   :  { %25 = vsyncpa [#allocation15], 0 }
   0x8   :  { %26 = vsyncpa [#allocation4], 0 }
   0x9   :  { %28 = vsyncpa [#allocation4 + $0x1], 0 }
   0xa   :  { %29 = vsyncpa [#allocation18], 0 }
   0xb   :  { %31 = vsyncpa [#allocation18 + $0x1], 0  ;;  %s3273_s18 = smov 0   ;;  %s3275_s19 = smov 0  }
   0xc   :  { %s3277_s20 = smov 0   ;;  %s3279_s21 = smov 0  }
   0xd LB: > { %4450 = sst [smem:[#allocation26_spill]] %s3149_s18  ;;  %s3294_s22 = sadd.s32 4294967295, %s3161_s21   ;;  %s3161_s21 = sphi %s3279_s21, %s4552_s21   ;;  %s3157_s20 = sphi %s3277_s20, %s4554_s20   ;;  %s3153_s19 = sphi %s3275_s19, %s4556_s19   ;;  %s3149_s18 = sphi %s3273_s18, %s4555_s18  }
   0xe   : > { %4451 = sst [smem:[#allocation27_spill]] %s3157_s20  ;;  %s2493_s23 = sadd.s32 4294967294, %s3161_s21  }
   0xf   : > { %4452 = sst [smem:[#allocation28_spill]] %s3161_s21  ;;  %s3298_s24 = sadd.s32 1, %s3161_s21  }
  0x10   : > { %4453 = sst [smem:[#allocation29_spill]] %s3298_s24  ;;  %s343_s25 = sadd.s32 1, %s3157_s20 }
  0x11   : > { %s340_s26 = ssub.s32 %s3161_s21, %s3298_s24  ;;  %p353_p0 = scmp.ne.s32.totalorder %s3157_s20, %s3153_s19 }
  0x12   : > { %p341_p1 = scmp.eq.s32.totalorder %s340_s26, 0  ;;  %p354_p2 = scmp.eq.s32.totalorder %s3294_s22, 1 }
  0x13   : > { %p359_p3 = scmp.ne.s32.totalorder %s3153_s19, %s3149_s18  ;;  %p360_p4 = scmp.eq.s32.totalorder %s2493_s23, 1 }
  0x14   : > { %s3309_s27 = scalar_select %p341_p1, %s3157_s20, %s343_s25  }
  0x15   : > { %p3311_p5 = por %p354_p2, %p353_p0  ;;  %p3315_p6 = por %p360_p4, %p359_p3 }
  0x16   : > { %4454 = sst [smem:[#allocation30_spill]] %s3309_s27  ;;  %p2494_p7 = scmp.ge.s32.totalorder %s3161_s21, 1 }
  0x17   : > { %s4455_s28 = scalar_select %p3311_p5, 1, 0 }
  0x18   : > { %s4456_s29 = scalar_select %p3315_p6, 1, 0 }
  0x19   : > { %p393_p8 = scmp.lt.s32.totalorder %s3161_s21, 3  ;;  %p4400_p9 = scmp.eq.s32.totalorder %s3294_s22, 0 }
  0x1a   : > { %4457 = sst [smem:[#allocation31_spill]] %s4456_s29  ;;  %s3163_s16 = smov [#allocation5]  }
  0x1b   : > { %p3322_p10 = pnand %p2494_p7, %p393_p8  ;;  %s417_s17 = sshll.u32 %s3163_s16, 4  ;;  %s418_s17 = int_to_ptr.vmem [resolvable:$true] %s417_s17 }
  0x1c   : > { %s3164_s23 = smov [#allocation8]   ;;  %s3165_s27 = smov [#allocation11]  }
  0x1d   : > { %s4458_s30 = scalar_select %p3322_p10, 1, 0 }
  0x1e   : > { %p2732_p11 = pneg %p3322_p10  ;;  %s444_s25 = sshll.u32 %s3164_s23, 4  ;;  %s445_s25 = int_to_ptr.vmem [resolvable:$true] %s444_s25 }
  0x1f   : > { %s467_s20 = sshll.u32 %s3165_s27, 4  ;;  %s2854_s16 = scalar_lea.vmem %s418_s17, 128  ;;  %s3334_s20 = int_to_ptr.vmem [resolvable:$true] %s467_s20 }
  0x20   : > { %p3330_p12 = pnand %p4400_p9, %p2732_p11  ;;  %p2855_p0 = scmp.ne.s32.totalorder %s418_s17, %s2854_s16 }
  0x21   : > { %p2862_p3 = scmp.lt.s32.totalorder %s418_s17, %s418_s17  ;;  %p2863_p4 = scmp.lt.s32.totalorder %s2854_s16, %s2854_s16 }
  0x22   : > { %p3338_p13 = pneg %p3330_p12 }
  0x23   : > { %p2864_p7 = por %p2863_p4, %p2862_p3 }
  0x24   : > { %p2857_p1 = pnand %p2855_p0, %p3338_p13 }
  0x26   : > { %p2858_p2 = pneg %p2857_p1 }
  0x28   : > { %p2865_p8 = pnand %p2864_p7, %p2858_p2 }
  0x2a   : > { %2868 = shalt.err (!%p2865_p8)
}
  0x2b   : > { %s4461_s2 = sld [smem:[#allocation66_spill]]  ;;  %s2880_s29 = scalar_lea.vmem %s445_s25, 128 }
  0x2c   : > { %p2881_p11 = scmp.ne.s32.totalorder %s445_s25, %s2880_s29  ;;  %p2888_p5 = scmp.lt.s32.totalorder %s445_s25, %s445_s25 }
  0x2d   : > { %p2889_p0 = scmp.lt.s32.totalorder %s2880_s29, %s2880_s29 }
  0x2e   : > { %p2883_p9 = pnand %p2881_p11, %p3338_p13 }
  0x2f   : > { %p2890_p1 = por %p2889_p0, %p2888_p5 }
  0x30   : > { %p2884_p6 = pneg %p2883_p9 }
  0x31   : > { %2738 = dma.hbm_to_vmem [thread:$0]  (!%p3330_p12), %s4461_s2, 128, %s418_s17, [#allocation6]  }
  0x32   : > { %p2891_p10 = pnand %p2890_p1, %p2884_p6 }
  0x34   : > { %2894 = shalt.err (!%p2891_p10)
}
  0x35   : > { %s4462_s5 = sld [smem:[#allocation67_spill]]  ;;  %s2906_s17 = scalar_lea.vmem %s3334_s20, 4096 }
  0x36   : > { %p2907_p2 = scmp.ne.s32.totalorder %s3334_s20, %s2906_s17  ;;  %p2914_p4 = scmp.lt.s32.totalorder %s3334_s20, %s3334_s20 }
  0x37   : > { %p2915_p5 = scmp.lt.s32.totalorder %s2906_s17, %s2906_s17 }
  0x38   : > { %p2909_p3 = pnand %p2907_p2, %p3338_p13 }
  0x39   : > { %p2916_p6 = por %p2915_p5, %p2914_p4 }
  0x3a   : > { %p2910_p9 = pneg %p2909_p3 }
  0x3b   : > { %2744 = dma.hbm_to_vmem [thread:$0]  (!%p3330_p12), %s4462_s5, 128, %s445_s25, [#allocation9]  }
  0x3c   : > { %p2917_p10 = pnand %p2916_p6, %p2910_p9 }
  0x3e   : > { %2920 = shalt.err (!%p2917_p10)
}
  0x3f   : > { %s4405_s29 = smov 256   ;;  %s3167_s18 = smov 16  }
  0x40   : > { %2750 = dma.hbm_to_vmem [thread:$0]  (!%p3330_p12), %s4387_s7, 4096, %s3334_s20, [#allocation12], %s4405_s29, %s4405_s29, %s3167_s18  }
  0x41   : > { %s3168_s23 = smov [#allocation2]   ;;  %s3169_s17 = smov [#allocation7]  }
  0x42   : > { %s406_s16 = sshll.u32 %s3168_s23, 4  ;;  %s430_s2 = sshll.u32 %s3169_s17, 4  ;;  %s407_s16 = int_to_ptr.vmem [resolvable:$true] %s406_s16  ;;  %s431_s2 = int_to_ptr.vmem [resolvable:$true] %s430_s2 }
  0x43   : > { %s2932_s5 = scalar_lea.vmem %s407_s16, 128  ;;  %p2940_p0 = scmp.lt.s32.totalorder %s407_s16, %s407_s16 }
  0x44   : > { %p2933_p7 = scmp.ne.s32.totalorder %s407_s16, %s2932_s5  ;;  %p2941_p1 = scmp.lt.s32.totalorder %s2932_s5, %s2932_s5 }
  0x46   : > { %p2935_p8 = pnand %p2933_p7, %p3338_p13  ;;  %p2942_p2 = por %p2941_p1, %p2940_p0 }
  0x48   : > { %p2936_p11 = pneg %p2935_p8 }
  0x4a   : > { %p2943_p3 = pnand %p2942_p2, %p2936_p11 }
  0x4c   : > { %2946 = shalt.err (!%p2943_p3)
}
  0x4d   : > { %2735 = dma.hbm_to_vmem [thread:$0]  (!%p3330_p12), %s4381_s1, 128, %s407_s16, [#allocation3]  }
  0x4e   : > { %s2958_s20 = scalar_lea.vmem %s431_s2, 256  ;;  %p2966_p6 = scmp.lt.s32.totalorder %s431_s2, %s431_s2 }
  0x4f   : > { %p2959_p9 = scmp.ne.s32.totalorder %s431_s2, %s2958_s20  ;;  %p2967_p10 = scmp.lt.s32.totalorder %s2958_s20, %s2958_s20 }
  0x51   : > { %p2961_p4 = pnand %p2959_p9, %p3338_p13  ;;  %p2968_p7 = por %p2967_p10, %p2966_p6 }
  0x53   : > { %p2962_p5 = pneg %p2961_p4 }
  0x55   : > { %p2969_p8 = pnand %p2968_p7, %p2962_p5 }
  0x57   : > { %2972 = shalt.err (!%p2969_p8)
}
  0x58   : > { %s3170_s5 = smov 128   ;;  %s3171_s27 = smov 8  }
  0x59   : > { %2741 = dma.hbm_to_vmem [thread:$0]  (!%p3330_p12), %s4384_s4, 256, %s431_s2, [#allocation6], %s3170_s5, %s3170_s5, %s3171_s27  }
  0x5a   : > { %s3172_s16 = smov [#allocation10]   ;;  %s3173_s25 = smov [#allocation13]  }
  0x5b   : > { %s454_s17 = sshll.u32 %s3172_s16, 4  ;;  %s480_s20 = sshll.u32 %s3173_s25, 4  ;;  %s455_s17 = int_to_ptr.vmem [resolvable:$true] %s454_s17  ;;  %s481_s20 = int_to_ptr.vmem [resolvable:$true] %s480_s20 }
  0x5c   : > { %s2984_s29 = scalar_lea.vmem %s455_s17, 4096  ;;  %p2992_p2 = scmp.lt.s32.totalorder %s455_s17, %s455_s17 }
  0x5d   : > { %p2985_p11 = scmp.ne.s32.totalorder %s455_s17, %s2984_s29  ;;  %p2993_p3 = scmp.lt.s32.totalorder %s2984_s29, %s2984_s29 }
  0x5f   : > { %p2987_p0 = pnand %p2985_p11, %p3338_p13  ;;  %p2994_p9 = por %p2993_p3, %p2992_p2 }
  0x61   : > { %p2988_p1 = pneg %p2987_p0 }
  0x63   : > { %p2995_p4 = pnand %p2994_p9, %p2988_p1 }
  0x65   : > { %2998 = shalt.err (!%p2995_p4)
}
  0x66   : > { %2747 = dma.hbm_to_vmem [thread:$0]  (!%p3330_p12), %s4386_s6, 4096, %s455_s17, [#allocation9], %s3170_s5, %s3170_s5, %s3171_s27  }
  0x67   : > { %s3010_s23 = scalar_lea.vmem %s481_s20, 2304  ;;  %p3018_p7 = scmp.lt.s32.totalorder %s481_s20, %s481_s20 }
  0x68   : > { %p3011_p5 = scmp.ne.s32.totalorder %s481_s20, %s3010_s23  ;;  %p3019_p8 = scmp.lt.s32.totalorder %s3010_s23, %s3010_s23 }
  0x6a   : > { %p3013_p6 = pnand %p3011_p5, %p3338_p13  ;;  %p3020_p11 = por %p3019_p8, %p3018_p7 }
  0x6c   : > { %p3014_p10 = pneg %p3013_p6 }
  0x6e   : > { %p3021_p0 = pnand %p3020_p11, %p3014_p10 }
  0x70   : > { %3024 = shalt.err (!%p3021_p0)
}
  0x71   : > { %s4463_s29 = smov 256   ;;  %s3174_s17 = smov [#allocation14]  }
  0x72   : > { %2753 = dma.hbm_to_vmem [thread:$0]  (!%p3330_p12), %s4388_s8, 2304, %s481_s20, [#allocation12], %s4463_s29, %s4463_s29, %s3167_s18  }
  0x73   : > { %s493_s2 = sshll.u32 %s3174_s17, 4  ;;  %s494_s2 = int_to_ptr.vmem [resolvable:$true] %s493_s2 }
  0x74   : > { %s3036_s21 = scalar_lea.vmem %s494_s2, 1152  ;;  %p3044_p9 = scmp.lt.s32.totalorder %s494_s2, %s494_s2 }
  0x75   : > { %p3037_p1 = scmp.ne.s32.totalorder %s494_s2, %s3036_s21  ;;  %p3045_p4 = scmp.lt.s32.totalorder %s3036_s21, %s3036_s21 }
  0x77   : > { %p3039_p2 = pnand %p3037_p1, %p3338_p13  ;;  %p3046_p5 = por %p3045_p4, %p3044_p9 }
  0x79   : > { %p3040_p3 = pneg %p3039_p2 }
  0x7b   : > { %p3047_p6 = pnand %p3046_p5, %p3040_p3 }
  0x7d   : > { %3050 = shalt.err (!%p3047_p6)
}
  0x7e   : > { %2756 = dma.hbm_to_vmem [thread:$0]  (!%p3330_p12), %s4389_s9, 1152, %s494_s2, [#allocation15], %s3170_s5, %s3170_s5, %s3171_s27  }
  0x7f   : > { %p4464_p10 = scmp.ne.s32.totalorder %s4458_s30, 0 }
  0x81   : > { %529 = sbr.rel (%p4464_p10) target bundleno = 1542 (0x606), region = 76 }
  0x86   : > { %p4465_p13 = scmp.eq.s32.totalorder %s3294_s22, 0 }
  0x88   : > { %3120 = dma.done.wait (%p4465_p13), [#allocation3], 128   ;;  %p4466_p7 = pmov %p4465_p13 }
  0x8a   : > { %3122 = vsyncadd (%p4466_p7), [#allocation3], 4294967168  ;;  %p4467_p8 = pmov %p4466_p7 }
  0x8b   : > { %p4468_p11 = pmov %p4466_p7 }
  0x8c   : > { %3124 = dma.done.wait (%p4467_p8), [#allocation6], 384  }
  0x8d   : > { %3126 = vsyncadd (%p4468_p11), [#allocation6], 4294966912  ;;  %p4469_p0 = pmov %p4466_p7 }
  0x8f   : > { %3128 = dma.done.wait (%p4469_p0), [#allocation9], 4224   ;;  %p4470_p12 = pmov %p4469_p0 }
  0x90   : > { %p4471_p1 = pmov %p4469_p0 }
  0x91   : > { %3130 = vsyncadd (%p4470_p12), [#allocation9], 4294963072 }
  0x92   : > { %3132 = dma.done.wait (%p4471_p1), [#allocation12], 6400   ;;  %p4472_p2 = pmov %p4469_p0 }
  0x93   : > { %p4473_p3 = pmov %p4469_p0 }
  0x94   : > { %3134 = vsyncadd (%p4472_p2), [#allocation12], 4294960896 }
  0x95   : > { %3136 = dma.done.wait (%p4473_p3), [#allocation15], 1152   ;;  %p4474_p9 = pmov %p4469_p0 }
  0x96   : > { %p610_p4 = scmp.lt.s32.totalorder %s3294_s22, 1  ;;  %v4406_v0 = vmov 0.0   ;;  %s3176_s24 = smov 94   ;;  %v3445_v1 = vld [vmem:[#allocation10 + $0xf8] sm:$0xff]  ;;  %v3449_v3 = vld [vmem:[#allocation10 + $0xf0] sm:$0xff]  ;;  %v3458_v5 = vld [vmem:[#allocation10 + $0xe8] sm:$0xff] }
  0x97   : > { %3138 = vsyncadd (%p4474_p9), [#allocation15], 4294966144  ;;  %765 = vrot.lane.b32.xlu1 %v4406_v0, %s3176_s24  ;;  %1082 = vmatprep.mubr.f32.mxu0 %v4406_v0  ;;  %v3447_v2 = vld [vmem:[#allocation10 + $0x78] sm:$0xff]  ;;  %v3452_v4 = vld [vmem:[#allocation10 + $0x70] sm:$0xff]  ;;  %s3177_s29 = smov 111   ;;  %s4446_s16 = smov 95  }
  0x98   : > { %s611_s30 = scalar_select %p610_p4, %s3294_s22, 1  ;;  %2532 = vmatprep.subr.mxu1 %v3445_v1  ;;  %v3461_v6 = vld [vmem:[#allocation10 + $0x68] sm:$0xff]  ;;  %v3464_v7 = vld [vmem:[#allocation10 + $0xe0] sm:$0xff]  ;;  %v3474_v10 = vld [vmem:[#allocation10 + $0xd8] sm:$0xff]  ;;  %vm767_vm0 = vcmask 769024   ;;  %vm720_vm1 = vcmask 908288  }
  0x99   : > { %2533 = vmatpush3.msra.mxu1 %v3447_v2  ;;  %v3469_v9 = vld [vmem:[#allocation10 + $0x60] sm:$0xff]  ;;  %v3479_v12 = vld [vmem:[#allocation10 + $0x58] sm:$0xff]  ;;  %v3483_v13 = vld [vmem:[#allocation10 + $0xd0] sm:$0xff]  ;;  %s4444_s25 = smov 96   ;;  %s3180_s17 = smov 110   ;;  %vm755_vm2 = vcmask 777216  }
  0x9a   : > { %s2530_s26 = sshll.u32 %s611_s30, 4  ;;  %2534 = vmatprep.subr.mxu1 %v3449_v3  ;;  %v3486_v14 = vld [vmem:[#allocation10 + $0x50] sm:$0xff]  ;;  %v3491_v15 = vld [vmem:[#allocation10 + $0xc8] sm:$0xff]  ;;  %v3497_v18 = vld [vmem:[#allocation10 + $0xc0] sm:$0xff]  ;;  %s3181_s2 = smov 112   ;;  %vm743_vm3 = vcmask 785408  }
  0x9b   : > { %s614_s20 = scalar_lea.vmem %s4380_s0, %s2530_s26  ;;  %2535 = vmatpush3.msra.mxu1 %v3452_v4  ;;  %v632_v16 = vld [vmem:[#allocation13 + $0x88] sm:$0xff]  ;;  %v3500_v19 = vld [vmem:[#allocation10 + $0x40] sm:$0xff]  ;;  %v3504_v21 = vld [vmem:[#allocation10 + $0xb8] sm:$0xff]  ;;  %s3182_s21 = smov 126   ;;  %vm731_vm4 = vcmask 900096   ;;  %vm710_vm5 = vcmask 916480  }
  0x9c   : > { %v3466_v8 = vld [vmem:[%s614_s20] sm:$0xff]  ;;  %2536 = vmatprep.subr.mxu1 %v3458_v5  ;;  %v3476_v11 = vld [vmem:[%s614_s20 + $0x8] sm:$0xff]  ;;  %v3494_v17 = vld [vmem:[#allocation10 + $0x48] sm:$0xff]  ;;  %s3183_s23 = smov 127   ;;  %s3184_s18 = smov 119   ;;  %vm698_vm6 = vcmask 1031168  }
  0x9d   : > { %761 = vrot.lane.b32.xlu0 %v3466_v8, %s3176_s24  ;;  %2537 = vmatpush3.msra.mxu1 %v3461_v6  ;;  %v631_v20 = vld [vmem:[#allocation13 + $0x80] sm:$0xff]  ;;  %v3508_v22 = vld [vmem:[#allocation10 + $0x38] sm:$0xff]  ;;  %v3511_v23 = vld [vmem:[#allocation10 + $0xb0] sm:$0xff]  ;;  %s3185_s30 = smov 118   ;;  %s3186_s26 = smov 120   ;;  %vm977_vm7 = vcmask 138240  }
  0x9e   : > { %2538 = vmatprep.subr.mxu1 %v3464_v7  ;;  %1155 = vmatprep.mubr.f32.mxu1 %v3476_v11  ;;  %4475 = vst [vmem:[#allocation32_spill] sm:$0xff] %v3511_v23  ;;  %v3514_v24 = vld [vmem:[#allocation10 + $0x30] sm:$0xff]  ;;  %v3519_v25 = vld [vmem:[#allocation10 + $0xa8] sm:$0xff]  ;;  %v3527_v28 = vld [vmem:[#allocation10 + $0xa0] sm:$0xff]  ;;  %s4442_s5 = smov 17   ;;  %vm686_vm8 = vcmask 1039360  }
  0x9f   : > { %2539 = vmatpush3.msra.mxu1 %v3469_v9  ;;  %823 = vrot.lane.b32.xlu1 %v631_v20, %s3177_s29  ;;  %4476 = vst [vmem:[#allocation33_spill] sm:$0xff] %v3514_v24  ;;  %4477 = vst [vmem:[#allocation34_spill] sm:$0xff] %v3519_v25  ;;  %v629_v26 = vld [vmem:[#allocation13 + $0x70] sm:$0xff]  ;;  %v3524_v27 = vld [vmem:[#allocation10 + $0x28] sm:$0xff]  ;;  %s3189_s27 = smov 9   ;;  %vm1188_vm9 = vcmask 965632  }
  0xa0   : > { %2540 = vmatprep.subr.mxu1 %v3474_v10  ;;  %4478 = vst [vmem:[#allocation35_spill] sm:$0xff] %v3524_v27  ;;  %4479 = vst [vmem:[#allocation36_spill] sm:$0xff] %v3527_v28  ;;  %v3530_v29 = vld [vmem:[#allocation10 + $0x20] sm:$0xff]  ;;  %v3534_v30 = vld [vmem:[#allocation10 + $0x98] sm:$0xff]  ;;  %vm1177_vm10 = vcmask 982016   ;;  %vm1014_vm11 = vcmask 588800  }
  0xa1   : > { %763 = vrot.lane.b32.xlu0 %v3476_v11, %s3176_s24  ;;  %2541 = vmatpush3.msra.mxu1 %v3479_v12  ;;  %4480 = vst [vmem:[#allocation37_spill] sm:$0xff] %v3530_v29  ;;  %4481 = vst [vmem:[#allocation38_spill] sm:$0xff] %v3534_v30  ;;  %v3539_v31 = vld [vmem:[#allocation10 + $0x18] sm:$0xff]  ;;  %v3542_v33 = vld [vmem:[#allocation10 + $0x90] sm:$0xff]  ;;  %vm3190_vm12 = vmmov 0   ;;  %vm1319_vm13 = vcmask 72704  }
  0xa2   : > { %2542 = vmatprep.subr.mxu1 %v3483_v13  ;;  %4482 = vst [vmem:[#allocation39_spill] sm:$0xff] %v3539_v31  ;;  %v630_v32 = vld [vmem:[#allocation13 + $0x78] sm:$0xff]  ;;  %4483 = vst [vmem:[#allocation40_spill] sm:$0xff] %v3542_v33  ;;  %v3545_v34 = vld [vmem:[#allocation10 + $0x10] sm:$0xff]  ;;  %p4547_p6 = scmp.ne.s32.totalorder %s4455_s28, 0 }
  0xa3   : > { %2543 = vmatpush3.msra.mxu1 %v3486_v14  ;;  %749 = vrot.lane.b32.xlu1 %v3466_v8, %s4446_s16  ;;  %4484 = vst [vmem:[#allocation41_spill] sm:$0xff] %v3545_v34  ;;  %v3550_v35 = vld [vmem:[#allocation10 + $0x88] sm:$0xff]  ;;  %v3557_v37 = vld [vmem:[#allocation10 + $0x80] sm:$0xff]  ;;  %v625_v41 = vld [vmem:[#allocation13 + $0x50] sm:$0xff] }
  0xa4   : > { %2544 = vmatprep.subr.mxu1 %v3491_v15  ;;  %4485 = vst [vmem:[#allocation42_spill] sm:$0xff] %v3550_v35  ;;  %v3554_v36 = vld [vmem:[#allocation10 + $0x8] sm:$0xff]  ;;  %4487 = vst [vmem:[#allocation44_spill] sm:$0xff] %v3557_v37  ;;  %v3560_v38 = vld [vmem:[#allocation10] sm:$0xff] }
  0xa5   : > { %825 = vrot.lane.b32.xlu0 %v632_v16, %s3177_s29  ;;  %2545 = vmatpush3.msra.mxu1 %v3494_v17  ;;  %4486 = vst [vmem:[#allocation43_spill] sm:$0xff] %v3554_v36  ;;  %4488 = vst [vmem:[#allocation45_spill] sm:$0xff] %v3560_v38  ;;  %v628_v39 = vld [vmem:[#allocation13 + $0x68] sm:$0xff]  ;;  %v627_v40 = vld [vmem:[#allocation13 + $0x60] sm:$0xff] }
  0xa6   : > { %2546 = vmatprep.subr.mxu1 %v3497_v18  ;;  %v626_v42 = vld [vmem:[#allocation13 + $0x58] sm:$0xff]  ;;  %v623_v43 = vld [vmem:[#allocation13 + $0x40] sm:$0xff]  ;;  %v624_v44 = vld [vmem:[#allocation13 + $0x48] sm:$0xff] }
  0xa7   : > { %2547 = vmatpush3.msra.mxu1 %v3500_v19  ;;  %753 = vrot.lane.b32.xlu1 %v4406_v0, %s4446_s16  ;;  %v621_v45 = vld [vmem:[#allocation13 + $0x30] sm:$0xff]  ;;  %v622_v46 = vld [vmem:[#allocation13 + $0x38] sm:$0xff]  ;;  %v620_v47 = vld [vmem:[#allocation13 + $0x28] sm:$0xff] }
  0xa8   : > { %2548 = vmatprep.subr.mxu1 %v3504_v21  ;;  %v619_v48 = vld [vmem:[#allocation13 + $0x20] sm:$0xff]  ;;  %v617_v49 = vld [vmem:[#allocation13 + $0x10] sm:$0xff]  ;;  %v618_v50 = vld [vmem:[#allocation13 + $0x18] sm:$0xff] }
  0xa9   : > { %751 = vrot.lane.b32.xlu0 %v3476_v11, %s4446_s16  ;;  %2549 = vmatpush3.msra.mxu1 %v3508_v22  ;;  %v616_v51 = vld [vmem:[#allocation13 + $0x8] sm:$0xff]  ;;  %v615_v52 = vld [vmem:[#allocation13] sm:$0xff]  ;;  %v641_v53 = vld [vmem:[#allocation14 + $0x40] sm:$0xff]  ;;  %s4524_s16 = smov 95  }
  0xaa   : > { %2550 = vmatprep.subr.mxu1 %v3511_v23  ;;  %v640_v54 = vld [vmem:[#allocation14 + $0x38] sm:$0xff]  ;;  %v639_v55 = vld [vmem:[#allocation14 + $0x30] sm:$0xff]  ;;  %v638_v56 = vld [vmem:[#allocation14 + $0x28] sm:$0xff] }
  0xab   : > { %2551 = vmatpush3.msra.mxu1 %v3514_v24  ;;  %821 = vrot.lane.b32.xlu1 %v630_v32, %s3177_s29  ;;  %v637_v57 = vld [vmem:[#allocation14 + $0x20] sm:$0xff]  ;;  %v636_v59 = vld [vmem:[#allocation14 + $0x18] sm:$0xff]  ;;  %v635_v60 = vld [vmem:[#allocation14 + $0x10] sm:$0xff] }
  0xac   : > { %2552 = vmatprep.subr.mxu1 %v3519_v25  ;;  %v633_v58 = vld [vmem:[#allocation14] sm:$0xff]  ;;  %v634_v61 = vld [vmem:[#allocation14 + $0x8] sm:$0xff] }
  0xad   : > { %819 = vrot.lane.b32.xlu0 %v629_v26, %s3177_s29  ;;  %2553 = vmatpush3.msra.mxu1 %v3524_v27 }
  0xae   : > { %2554 = vmatprep.subr.mxu1 %v3527_v28 }
  0xaf   : > { %2555 = vmatpush3.msra.mxu1 %v3530_v29  ;;  %739 = vrot.lane.b32.xlu1 %v3476_v11, %s4444_s25 }
  0xb0   : > { %2556 = vmatprep.subr.mxu1 %v3534_v30 }
  0xb1   : > { %737 = vrot.lane.b32.xlu0 %v3466_v8, %s4444_s25  ;;  %2557 = vmatpush3.msra.mxu1 %v3539_v31 }
  0xb2   : > { %2558 = vmatprep.subr.mxu1 %v3542_v33 }
  0xb3   : > { %2559 = vmatpush3.msra.mxu1 %v3545_v34  ;;  %815 = vrot.lane.b32.xlu1 %v627_v40, %s3177_s29 }
  0xb4   : > { %2560 = vmatprep.subr.mxu1 %v3550_v35 }
  0xb5   : > { %741 = vrot.lane.b32.xlu0 %v4406_v0, %s4444_s25  ;;  %2561 = vmatpush3.msra.mxu1 %v3554_v36  ;;  %s4525_s25 = smov 96  }
  0xb6   : > { %2562 = vmatprep.subr.mxu1 %v3557_v37 }
  0xb7   : > { %2563 = vmatpush3.msra.mxu1 %v3560_v38  ;;  %725 = vrot.lane.b32.xlu1 %v3466_v8, %s3180_s17 }
  0xb8   : > { %1156 = vmatmul.mubr.f32.vlgmr.msra.gmra.mxu1 %v3466_v8 }
  0xb9   : > { %817 = vrot.lane.b32.xlu0 %v628_v39, %s3177_s29 }
  0xbb   : > { %729 = vrot.lane.b32.xlu1 %v4406_v0, %s3180_s17 }
  0xbd   : > { %727 = vrot.lane.b32.xlu0 %v3476_v11, %s3180_s17 }
  0xbf   : > { %813 = vrot.lane.b32.xlu1 %v626_v42, %s3177_s29 }
  0xc1   : > { %811 = vrot.lane.b32.xlu0 %v625_v41, %s3177_s29 }
  0xc3   : > { %718 = vrot.lane.b32.xlu1 %v3476_v11, %s3177_s29 }
  0xc5   : > { %716 = vrot.lane.b32.xlu0 %v3466_v8, %s3177_s29 }
  0xc7   : > { %809 = vrot.lane.b32.xlu1 %v624_v44, %s3177_s29 }
  0xc9   : > { %807 = vrot.lane.b32.xlu0 %v623_v43, %s3177_s29 }
  0xcb   : > { %708 = vrot.lane.b32.xlu1 %v3476_v11, %s3181_s2 }
  0xcd   : > { %706 = vrot.lane.b32.xlu0 %v3466_v8, %s3181_s2 }
  0xcf   : > { %805 = vrot.lane.b32.xlu1 %v622_v46, %s3177_s29 }
  0xd1   : > { %803 = vrot.lane.b32.xlu0 %v621_v45, %s3177_s29 }
  0xd3   : > { %694 = vrot.lane.b32.xlu1 %v3466_v8, %s3182_s21 }
  0xd5   : > { %704 = vrot.lane.b32.xlu0 %v4406_v0, %s3181_s2 }
  0xd7   : > { %799 = vrot.lane.b32.xlu1 %v619_v48, %s3177_s29 }
  0xd9   : > { %696 = vrot.lane.b32.xlu0 %v3476_v11, %s3182_s21 }
  0xdb   : > { %692 = vrot.lane.b32.xlu1 %v4406_v0, %s3182_s21 }
  0xdd   : > { %801 = vrot.lane.b32.xlu0 %v620_v47, %s3177_s29 }
  0xdf   : > { %684 = vrot.lane.b32.xlu1 %v3476_v11, %s3183_s23 }
  0xe1   : > { %682 = vrot.lane.b32.xlu0 %v3466_v8, %s3183_s23 }
  0xe3   : > { %797 = vrot.lane.b32.xlu1 %v618_v50, %s3177_s29 }
  0xe5   : > { %795 = vrot.lane.b32.xlu0 %v617_v49, %s3177_s29 }
  0xe7   : > { %791 = vrot.lane.b32.xlu1 %v615_v52, %s3177_s29 }
  0xe9   : > { %680 = vrot.lane.b32.xlu0 %v4406_v0, %s3183_s23 }
  0xeb   : > { %1232 = vrot.lane.b32.xlu1 %v640_v54, %s3184_s18 }
  0xed   : > { %793 = vrot.lane.b32.xlu0 %v616_v51, %s3177_s29 }
  0xef   : > { %1230 = vrot.lane.b32.xlu1 %v639_v55, %s3184_s18 }
  0xf1   : > { %1234 = vrot.lane.b32.xlu0 %v641_v53, %s3184_s18 }
  0xf3   : > { %1186 = vrot.lane.b32.xlu1 %v4406_v0, %s3185_s30 }
  0xf5   : > { %1199 = vrot.lane.b32.xlu0 %v4406_v0, %s3177_s29 }
  0xf7   : > { %1173 = vrot.lane.b32.xlu1 %v4406_v0, %s3186_s26 }
  0xf9   : > { %1228 = vrot.lane.b32.xlu0 %v638_v56, %s3184_s18 }
  0xfb   : > { %1224 = vrot.lane.b32.xlu1 %v636_v59, %s3184_s18 }
  0xfd   : > { %1226 = vrot.lane.b32.xlu0 %v637_v57, %s3184_s18 }
  0xff   : > { %1222 = vrot.lane.b32.xlu1 %v635_v60, %s3184_s18 }
 0x101   : > { %1218 = vrot.lane.b32.xlu0 %v633_v58, %s3184_s18 }
 0x103   : > { %1220 = vrot.lane.b32.xlu1 %v634_v61, %s3184_s18 }
 0x109   : > { %v3627_v63 = vpop.permute.xlu1 %765 }
 0x10a   : > { %4489 = vst [vmem:[#allocation46_spill] sm:$0xff] %v3627_v63 }
 0x10f   : > { %v762_v62 = vpop.permute.xlu0 %761 }
 0x111   : > { %v3632_v32 = vpop.permute.xlu1 %823 }
 0x112   : > { %4491 = vst [vmem:[#allocation48_spill] sm:$0xff] %v3632_v32  ;;  %v887_v39 = vmul.f32 %v3632_v32, %v762_v62 }
 0x113   : > { %v764_v16 = vpop.permute.xlu0 %763 }
 0x114   : > { %v768_v26 = vsel %vm767_vm0, %v762_v62, %v764_v16  ;;  %971 = vrot.lane.b32.xlu1 %v887_v39, %s4442_s5  ;;  %v769_v45 = vsel %vm767_vm0, %v764_v16, %v3627_v63 }
 0x115   : > { %v750_v43 = vpop.permute.xlu1 %749 }
 0x117   : > { %v3629_v20 = vpop.permute.xlu0 %825 }
 0x118   : > { %4490 = vst [vmem:[#allocation47_spill] sm:$0xff] %v3629_v20  ;;  %v3638_v40 = vsel %vm720_vm1, %v3632_v32, %v3629_v20  ;;  %v889_v49 = vmul.f32 %v3629_v20, %v769_v45 }
 0x119   : > { %4492 = vst [vmem:[#allocation49_spill] sm:$0xff] %v3638_v40  ;;  %v888_v42 = vmul.f32 %v3638_v40, %v768_v26  ;;  %v3648_v47 = vpop.permute.xlu1 %753 }
 0x11a   : > { %4494 = vst [vmem:[#allocation51_spill] sm:$0xff] %v3648_v47 }
 0x11b   : > { %v752_v41 = vpop.permute.xlu0 %751  ;;  %973 = vrot.lane.b32.xlu1 %v888_v42, %s4442_s5 }
 0x11c   : > { %v757_v48 = vsel %vm755_vm2, %v752_v41, %v3648_v47  ;;  %v756_v51 = vsel %vm755_vm2, %v750_v43, %v752_v41 }
 0x11d   : > { %v3657_v52 = vpop.permute.xlu1 %821 }
 0x11e   : > { %4495 = vst [vmem:[#allocation52_spill] sm:$0xff] %v3657_v52  ;;  %v886_v54 = vmul.f32 %v3657_v52, %v757_v48 }
 0x11f   : > { %v3642_v44 = vpop.permute.xlu0 %819 }
 0x120   : > { %4493 = vst [vmem:[#allocation50_spill] sm:$0xff] %v3642_v44  ;;  %v884_v46 = vmul.f32 %v3642_v44, %v750_v43  ;;  %v3662_v53 = vsel %vm720_vm1, %v3642_v44, %v3657_v52  ;;  %969 = vrot.lane.b32.xlu1 %v886_v54, %s4442_s5 }
 0x121   : > { %4496 = vst [vmem:[#allocation53_spill] sm:$0xff] %v3662_v53  ;;  %v885_v55 = vmul.f32 %v3662_v53, %v756_v51  ;;  %v740_v57 = vpop.permute.xlu1 %739 }
 0x122   : > { %965 = vrot.lane.b32.xlu0 %v884_v46, %s4442_s5 }
 0x123   : > { %v3654_v50 = vpop.permute.xlu0 %737 }
 0x124   : > { %v744_v60 = vsel %vm743_vm3, %v3654_v50, %v740_v57 }
 0x125   : > { %v3677_v61 = vpop.permute.xlu1 %815 }
 0x126   : > { %975 = vrot.lane.b32.xlu0 %v889_v49, %s4442_s5  ;;  %4499 = vst [vmem:[#allocation56_spill] sm:$0xff] %v3677_v61 }
 0x127   : > { %v3667_v56 = vpop.permute.xlu0 %741 }
 0x128   : > { %4497 = vst [vmem:[#allocation54_spill] sm:$0xff] %v3667_v56  ;;  %v745_v58 = vsel %vm743_vm3, %v740_v57, %v3667_v56 }
 0x129   : > { %v726_v41 = vpop.permute.xlu1 %725 }
 0x12a   : > { %967 = vrot.lane.b32.xlu0 %v885_v55, %s4442_s5 }
 0x12b   : > { %v3673_v59 = vpop.permute.xlu0 %817 }
 0x12c   : > { %4498 = vst [vmem:[#allocation55_spill] sm:$0xff] %v3673_v59  ;;  %v883_v62 = vmul.f32 %v3673_v59, %v745_v58  ;;  %v3683_v16 = vsel %vm720_vm1, %v3677_v61, %v3673_v59 }
 0x12d   : > { %4500 = vst [vmem:[#allocation57_spill] sm:$0xff] %v3683_v16  ;;  %v882_v26 = vmul.f32 %v3683_v16, %v744_v60  ;;  %v3690_v43 = vpop.permute.xlu1 %729 }
 0x12e   : > { %963 = vrot.lane.b32.xlu0 %v883_v62, %s4442_s5 }
 0x12f   : > { %v728_v39 = vpop.permute.xlu0 %727  ;;  %961 = vrot.lane.b32.xlu1 %v882_v26, %s4442_s5 }
 0x130   : > { %v732_v46 = vsel %vm731_vm4, %v726_v41, %v728_v39  ;;  %v733_v27 = vsel %vm731_vm4, %v728_v39, %v3690_v43 }
 0x131   : > { %v3695_v48 = vpop.permute.xlu1 %813 }
 0x132   : > { %4502 = vst [vmem:[#allocation59_spill] sm:$0xff] %v3695_v48 }
 0x133   : > { %v3688_v42 = vpop.permute.xlu0 %811 }
 0x134   : > { %4501 = vst [vmem:[#allocation58_spill] sm:$0xff] %v3688_v42  ;;  %v3700_v49 = vsel %vm720_vm1, %v3688_v42, %v3695_v48  ;;  %v878_v28 = vmul.f32 %v3688_v42, %v726_v41  ;;  %v880_v41 = vmul.f32 %v3695_v48, %v733_v27 }
 0x135   : > { %4503 = vst [vmem:[#allocation60_spill] sm:$0xff] %v3700_v49  ;;  %v879_v51 = vmul.f32 %v3700_v49, %v732_v46  ;;  %v719_v55 = vpop.permute.xlu1 %718 }
 0x137   : > { %v3692_v45 = vpop.permute.xlu0 %716  ;;  %955 = vrot.lane.b32.xlu0 %v879_v51, %s4442_s5 }
 0x139   : > { %v3706_v57 = vpop.permute.xlu1 %809 }
 0x13a   : > { %4505 = vst [vmem:[#allocation62_spill] sm:$0xff] %v3706_v57  ;;  %v877_v24 = vmul.f32 %v3706_v57, %v719_v55 }
 0x13b   : > { %v3703_v54 = vpop.permute.xlu0 %807 }
 0x13c   : > { %4504 = vst [vmem:[#allocation61_spill] sm:$0xff] %v3703_v54  ;;  %v875_v27 = vmul.f32 %v3703_v54, %v3692_v45 }
 0x13d   : > { %v709_v60 = vpop.permute.xlu1 %708 }
 0x13f   : > { %v3708_v58 = vpop.permute.xlu0 %706 }
 0x140   : > { %v712_v48 = vsel %vm710_vm5, %v3708_v58, %v709_v60 }
 0x141   : > { %v3712_v26 = vpop.permute.xlu1 %805 }
 0x142   : > { %4506 = vst [vmem:[#allocation63_spill] sm:$0xff] %v3712_v26 }
 0x143   : > { %v3710_v62 = vpop.permute.xlu0 %803 }
 0x145   : > { %v3714_v0 = vpop.permute.xlu1 %694 }
 0x147   : > { %v3716_v59 = vpop.permute.xlu0 %704 }
 0x149   : > { %v3718_v16 = vpop.permute.xlu1 %799 }
 0x14b   : > { %v3720_v46 = vpop.permute.xlu0 %696 }
 0x14d   : > { %v3722_v49 = vpop.permute.xlu1 %692 }
 0x14f   : > { %v3726_v56 = vpop.permute.xlu0 %801 }
 0x151   : > { %v3724_v51 = vpop.permute.xlu1 %684 }
 0x153   : > { %v3730_v44 = vpop.permute.xlu0 %682 }
 0x155   : > { %v3728_v52 = vpop.permute.xlu1 %797 }
 0x157   : > { %v3734_v53 = vpop.permute.xlu0 %795 }
 0x159   : > { %v3732_v47 = vpop.permute.xlu1 %791 }
 0x15b   : > { %v3738_v20 = vpop.permute.xlu0 %680 }
 0x15d   : > { %v3736_v32 = vpop.permute.xlu1 %1232 }
 0x15f   : > { %v3742_v63 = vpop.permute.xlu0 %793 }
 0x161   : > { %v3740_v40 = vpop.permute.xlu1 %1230 }
 0x163   : > { %v3746_v37 = vpop.permute.xlu0 %1234 }
 0x165   : > { %v3744_v38 = vpop.permute.xlu1 %1186 }
 0x167   : > { %v3752_v31 = vpop.permute.xlu0 %1199 }
 0x169   : > { %v3748_v36 = vpop.permute.xlu1 %1173 }
 0x16b   : > { %v3764_v29 = vpop.permute.xlu0 %1228 }
 0x16d   : > { %v3758_v30 = vpop.permute.xlu1 %1224 }
 0x16f   : > { %v3776_v25 = vpop.permute.xlu0 %1226 }
 0x173   : > { %v3795_v39 = vpop.permute.xlu0 %1218 }
 0x178   : > { %v2564_v35 = vpop.f32.mrf.mxu1 }
 0x17a   : > { %v2565_v34 = vpop.f32.mrf.mxu1 }
 0x17b   : > { %v3750_v33 = vadd.f32 %v2565_v34, %v2564_v35  ;;  %v881_v34 = vmul.f32 %v3677_v61, %v3654_v50  ;;  %v3768_v35 = vpop.permute.xlu1 %1222  ;;  %v721_v61 = vsel %vm720_vm1, %v3692_v45, %v719_v55  ;;  %v874_v55 = vmul.f32 %v3712_v26, %v709_v60 }
 0x17c   : > { %v700_v45 = vsel %vm698_vm6, %v3714_v0, %v3720_v46 }
 0x17d   : > { %1192 = vrot.lane.b32.xlu0 %v3750_v33, %s3181_s2  ;;  %1204 = vrot.lane.b32.xlu1 %v3750_v33, %s3180_s17 }
 0x17f   : > { %v3781_v50 = vpop.permute.xlu1 %1220 }
 0x181   : > { %1184 = vrot.lane.b32.xlu0 %v3750_v33, %s3185_s30  ;;  %1197 = vrot.lane.b32.xlu1 %v3750_v33, %s3177_s29 }
 0x185   : > { %1175 = vrot.lane.b32.xlu0 %v3750_v33, %s3186_s26  ;;  %959 = vrot.lane.b32.xlu1 %v881_v34, %s4442_s5  ;;  %v3788_v34 = vsel %vm720_vm1, %v3703_v54, %v3706_v57  ;;  %v711_v54 = vsel %vm710_vm5, %v3716_v59, %v3708_v58  ;;  %v699_v58 = vsel %vm698_vm6, %v3722_v49, %v3714_v0 }
 0x186   : > { %4507 = vst [vmem:[#allocation64_spill] sm:$0xff] %v3788_v34  ;;  %v972_v42 = vpop.permute.xlu1 %971  ;;  %v688_v0 = vsel %vm686_vm8, %v3730_v44, %v3724_v51 }
 0x189   : > { %953 = vrot.lane.b32.xlu0 %v878_v28, %s4442_s5  ;;  %1181 = vrot.lane.b32.xlu1 %v3750_v33, %s3184_s18  ;;  %v876_v28 = vmul.f32 %v3788_v34, %v721_v61  ;;  %v3808_v61 = vsel %vm720_vm1, %v3710_v62, %v3712_v26  ;;  %v872_v26 = vmul.f32 %v3710_v62, %v711_v54 }
 0x18a   : > { %4508 = vst [vmem:[#allocation65_spill] sm:$0xff] %v3808_v61  ;;  %v871_v54 = vmul.f32 %v3726_v56, %v3720_v46  ;;  %v868_v46 = vmul.f32 %v3728_v52, %v3724_v51 }
 0x18d   : > { %1168 = vrot.lane.b32.xlu0 %v3750_v33, %s3182_s21  ;;  %957 = vrot.lane.b32.xlu1 %v880_v41, %s4442_s5  ;;  %v974_v57 = vpop.permute.xlu1 %973 }
 0x18e   : > { %v994_v60 = vsel %vm977_vm7, %v972_v42, %v974_v57 }
 0x191   : > { %1163 = vrot.lane.b32.xlu0 %v3750_v33, %s3183_s23  ;;  %949 = vrot.lane.b32.xlu1 %v876_v28, %s4442_s5  ;;  %v873_v28 = vmul.f32 %v3808_v61, %v712_v48 }
 0x192   : > { %v970_v34 = vpop.permute.xlu1 %969 }
 0x194   : > { %v966_v41 = vpop.permute.xlu0 %965 }
 0x195   : > { %951 = vrot.lane.b32.xlu0 %v877_v24, %s4442_s5  ;;  %947 = vrot.lane.b32.xlu1 %v875_v27, %s4442_s5  ;;  %v3823_v24 = vsel %vm720_vm1, %v3718_v16, %v3726_v56 }
 0x196   : > { %v870_v61 = vmul.f32 %v3823_v24, %v700_v45 }
 0x198   : > { %v976_v27 = vpop.permute.xlu0 %975 }
 0x199   : > { %v995_v48 = vsel %vm977_vm7, %v974_v57, %v976_v27  ;;  %943 = vrot.lane.b32.xlu0 %v873_v28, %s4442_s5  ;;  %945 = vrot.lane.b32.xlu1 %v874_v55, %s4442_s5  ;;  %v869_v57 = vmul.f32 %v3718_v16, %v699_v58  ;;  %v3847_v28 = vsel %vm720_vm1, %v3734_v53, %v3728_v52 }
 0x19a   : > { %1032 = vmatprep.subr.mxu0 %v995_v48  ;;  %v863_v48 = vmul.f32 0.0, %v3732_v47 }
 0x19b   : > { %1033 = vmatpush1.msra.mxu0 %v994_v60  ;;  %v3188_v60 = vmov 0  }
 0x19c   : > { %v968_v23 = vpop.permute.xlu0 %967  ;;  %2842 = vset.pattern.permute.xlu0 %v3188_v60  ;;  %2841 = vset.pattern.permute.xlu1 %v3188_v60 }
 0x19d   : > { %v993_v27 = vsel %vm977_vm7, %v968_v23, %v970_v34  ;;  %v992_v42 = vsel %vm977_vm7, %v966_v41, %v968_v23  ;;  %941 = vrot.lane.b32.xlu0 %v872_v26, %s4442_s5  ;;  %937 = vrot.lane.b32.xlu1 %v870_v61, %s4442_s5  ;;  %v867_v26 = vmul.f32 %v3847_v28, %v688_v0 }
 0x19e   : > { %1034 = vmatprep.subr.mxu0 %v993_v27  ;;  %v3857_v61 = vsel %vm720_vm1, %v3732_v47, %v3742_v63  ;;  %v687_v41 = vsel %vm686_vm8, %v3738_v20, %v3730_v44  ;;  %v865_v44 = vmul.f32 %v3742_v63, %v3476_v11 }
 0x19f   : > { %1035 = vmatpush1.msra.mxu0 %v992_v42  ;;  %v866_v45 = vmul.f32 %v3734_v53, %v687_v41  ;;  %v864_v51 = vmul.f32 %v3857_v61, %v3466_v8 }
 0x1a0   : > { %v964_v23 = vpop.permute.xlu0 %963 }
 0x1a1   : > { %939 = vrot.lane.b32.xlu0 %v871_v54, %s4442_s5  ;;  %935 = vrot.lane.b32.xlu1 %v869_v57, %s4442_s5  ;;  %v962_v34 = vpop.permute.xlu1 %961 }
 0x1a2   : > { %v991_v55 = vsel %vm977_vm7, %v962_v34, %v964_v23 }
 0x1a3   : > { %1036 = vmatprep.subr.mxu0 %v991_v55 }
 0x1a5   : > { %931 = vrot.lane.b32.xlu0 %v867_v26, %s4442_s5  ;;  %933 = vrot.lane.b32.xlu1 %v868_v46, %s4442_s5 }
 0x1a9   : > { %929 = vrot.lane.b32.xlu0 %v866_v45, %s4442_s5  ;;  %925 = vrot.lane.b32.xlu1 %v864_v51, %s4442_s5  ;;  %v956_v58 = vpop.permute.xlu0 %955 }
 0x1ad   : > { %927 = vrot.lane.b32.xlu0 %v865_v44, %s4442_s5  ;;  %923 = vrot.lane.b32.xlu1 %v863_v48, %s4442_s5  ;;  %s2531_s5 = sshll.u32 %s3294_s22, 8 }
 0x1ef   : > { %v1193_v27 = vpop.permute.xlu0 %1192  ;;  %v1205_v42 = vpop.permute.xlu1 %1204 }
 0x1f0   : > { %v1206_v8 = vsel %vm731_vm4, %v1205_v42, %v3690_v43  ;;  %v1260_v47 = vmul.f32 %v3746_v37, %v1205_v42  ;;  %v1194_v46 = vsel %vm710_vm5, %v1193_v27, %v3716_v59  ;;  %v1256_v45 = vmul.f32 %v3740_v40, %v1193_v27 }
 0x1f1   : > { %v1261_v54 = vmul.f32 %v3746_v37, %v1206_v8  ;;  %v1257_v48 = vmul.f32 %v3740_v40, %v1194_v46 }
 0x1f2   : > { %1315 = vrot.lane.b32.xlu0 %v1260_v47, %s3189_s27 }
 0x1f3   : > { %v1185_v11 = vpop.permute.xlu0 %1184  ;;  %1317 = vrot.lane.b32.xlu1 %v1261_v54, %s3189_s27  ;;  %v1198_v57 = vpop.permute.xlu1 %1197 }
 0x1f4   : > { %v1201_v0 = vsel %vm720_vm1, %v1198_v57, %v3752_v31  ;;  %v1258_v23 = vmul.f32 %v3736_v32, %v1198_v57  ;;  %v1189_v44 = vsel %vm1188_vm9, %v1185_v11, %v3744_v38  ;;  %v1254_v8 = vmul.f32 %v3764_v29, %v1185_v11 }
 0x1f5   : > { %v1259_v26 = vmul.f32 %v3736_v32, %v1201_v0  ;;  %v1255_v47 = vmul.f32 %v3764_v29, %v1189_v44 }
 0x1f6   : > { %1311 = vrot.lane.b32.xlu0 %v1258_v23, %s3189_s27 }
 0x1f7   : > { %v1176_v41 = vpop.permute.xlu0 %1175  ;;  %1313 = vrot.lane.b32.xlu1 %v1259_v26, %s3189_s27  ;;  %v960_v55 = vpop.permute.xlu1 %959 }
 0x1f8   : > { %v990_v51 = vsel %vm977_vm7, %v960_v55, %v962_v34  ;;  %v1178_v34 = vsel %vm1177_vm10, %v3748_v36, %v1176_v41 }
 0x1f9   : > { %1037 = vmatpush1.msra.mxu0 %v990_v51  ;;  %v1251_v11 = vmul.f32 %v3758_v30, %v1178_v34 }
 0x1fa   : > { %1307 = vrot.lane.b32.xlu0 %v1256_v45, %s3189_s27  ;;  %v1252_v45 = vmul.f32 %v3758_v30, %v1176_v41 }
 0x1fb   : > { %v954_v60 = vpop.permute.xlu0 %953  ;;  %1309 = vrot.lane.b32.xlu1 %v1257_v48, %s3189_s27  ;;  %v1182_v42 = vpop.permute.xlu1 %1181 }
 0x1fc   : > { %v1253_v57 = vmul.f32 %v3776_v25, %v1182_v42  ;;  %v988_v23 = vsel %vm977_vm7, %v954_v60, %v956_v58 }
 0x1fe   : > { %1303 = vrot.lane.b32.xlu0 %v1254_v8, %s3189_s27 }
 0x1ff   : > { %v1169_v27 = vpop.permute.xlu0 %1168  ;;  %1305 = vrot.lane.b32.xlu1 %v1255_v47, %s3189_s27  ;;  %v958_v54 = vpop.permute.xlu1 %957 }
 0x200   : > { %v989_v0 = vsel %vm977_vm7, %v956_v58, %v958_v54  ;;  %v1170_v26 = vsel %vm698_vm6, %v3722_v49, %v1169_v27  ;;  %v1250_v60 = vmul.f32 %v3768_v35, %v1169_v27  ;;  %v1245_v27 = vmul.f32 0.0, %v3795_v39 }
 0x201   : > { %1038 = vmatprep.subr.mxu0 %v989_v0  ;;  %v1249_v51 = vmul.f32 %v3768_v35, %v1170_v26 }
 0x202   : > { %1301 = vrot.lane.b32.xlu0 %v1253_v57, %s3189_s27  ;;  %1039 = vmatpush1.msra.mxu0 %v988_v23 }
 0x203   : > { %v1164_v46 = vpop.permute.xlu0 %1163  ;;  %1297 = vrot.lane.b32.xlu1 %v1251_v11, %s3189_s27  ;;  %v950_v55 = vpop.permute.xlu1 %949  ;;  %v1246_v11 = vmul.f32 %v3750_v33, %v3795_v39 }
 0x204   : > { %v1165_v48 = vsel %vm686_vm8, %v3738_v20, %v1164_v46  ;;  %v1248_v54 = vmul.f32 %v3781_v50, %v1164_v46  ;;  %v1262_v46 = vld [vmem:[%s4391_s11] sm:$0xff] }
 0x205   : > { %v1247_v47 = vmul.f32 %v3781_v50, %v1165_v48 }
 0x206   : > { %1299 = vrot.lane.b32.xlu0 %v1252_v45, %s3189_s27 }
 0x207   : > { %v952_v58 = vpop.permute.xlu0 %951  ;;  %1293 = vrot.lane.b32.xlu1 %v1249_v51, %s3189_s27  ;;  %v948_v44 = vpop.permute.xlu1 %947  ;;  %v890_v51 = vld [vmem:[%s4390_s10] sm:$0xff] }
 0x208   : > { %v987_v42 = vsel %vm977_vm7, %v950_v55, %v952_v58  ;;  %v986_v8 = vsel %vm977_vm7, %v948_v44, %v950_v55 }
 0x209   : > { %1040 = vmatprep.subr.mxu0 %v987_v42 }
 0x20a   : > { %1295 = vrot.lane.b32.xlu0 %v1250_v60, %s3189_s27  ;;  %1041 = vmatpush1.msra.mxu0 %v986_v8 }
 0x20b   : > { %v944_v41 = vpop.permute.xlu0 %943  ;;  %1289 = vrot.lane.b32.xlu1 %v1247_v47, %s3189_s27  ;;  %v946_v34 = vpop.permute.xlu1 %945 }
 0x20c   : > { %v985_v57 = vsel %vm977_vm7, %v944_v41, %v946_v34 }
 0x20d   : > { %1042 = vmatprep.subr.mxu0 %v985_v57 }
 0x20e   : > { %1291 = vrot.lane.b32.xlu0 %v1248_v54, %s3189_s27 }
 0x20f   : > { %v942_v0 = vpop.permute.xlu0 %941  ;;  %1285 = vrot.lane.b32.xlu1 %v1245_v27, %s3189_s27  ;;  %v938_v23 = vpop.permute.xlu1 %937  ;;  %v676_v27 = vld [vmem:[#allocation2] sm:$0xff] }
 0x210   : > { %v984_v26 = vsel %vm977_vm7, %v942_v0, %v944_v41  ;;  %v4509_v0 = vmov 0.0  }
 0x211   : > { %1043 = vmatpush1.msra.mxu0 %v984_v26 }
 0x212   : > { %1287 = vrot.lane.b32.xlu0 %v1246_v11, %s3189_s27 }
 0x213   : > { %v940_v55 = vpop.permute.xlu0 %939  ;;  %v936_v45 = vpop.permute.xlu1 %935  ;;  %1265 = vperm.xlu1 %2841, %v1262_v46  }
 0x214   : > { %v983_v48 = vsel %vm977_vm7, %v938_v23, %v940_v55  ;;  %v982_v33 = vsel %vm977_vm7, %v936_v45, %v938_v23 }
 0x215   : > { %1044 = vmatprep.subr.mxu0 %v983_v48 }
 0x216   : > { %1045 = vmatpush1.msra.mxu0 %v982_v33  ;;  %893 = vperm.xlu0 %2842, %v890_v51  }
 0x217   : > { %v932_v58 = vpop.permute.xlu0 %931  ;;  %v934_v44 = vpop.permute.xlu1 %933 }
 0x218   : > { %v981_v60 = vsel %vm977_vm7, %v932_v58, %v934_v44 }
 0x219   : > { %1046 = vmatprep.subr.mxu0 %v981_v60 }
 0x21b   : > { %v930_v42 = vpop.permute.xlu0 %929  ;;  %v926_v8 = vpop.permute.xlu1 %925 }
 0x21c   : > { %v980_v47 = vsel %vm977_vm7, %v930_v42, %v932_v58 }
 0x21d   : > { %1047 = vmatpush1.msra.mxu0 %v980_v47 }
 0x21f   : > { %v928_v41 = vpop.permute.xlu0 %927  ;;  %v3941_v34 = vpop.permute.xlu1 %923 }
 0x220   : > { %v979_v54 = vsel %vm977_vm7, %v926_v8, %v928_v41  ;;  %v978_v57 = vsel %vm977_vm7, %v3941_v34, %v926_v8 }
 0x221   : > { %1048 = vmatprep.subr.mxu0 %v979_v54 }
 0x222   : > { %1049 = vmatpush1.msra.mxu0 %v978_v57 }
 0x223   : > { %2517 = vmatmul.mubr.msk.f32.vlgmr.msra.gmra.mxu0 %vm1014_vm11, %v676_v27  ;;  %2633 = vmatprep.subr.mxu0 %v4509_v0 }
 0x224   : > { %2651 = vmatprep.mubr.msk.f32.mxu0 %vm3190_vm12, %v4509_v0 }
 0x264   : > { %v1316_v23 = vpop.permute.xlu0 %1315 }
 0x265   : > { %v1318_v11 = vpop.permute.xlu1 %1317 }
 0x266   : > { %v1327_v26 = vsel %vm1319_vm13, %v1316_v23, %v1318_v11 }
 0x267   : > { %2634 = vmatpush3.msra.mxu0 %v1327_v26 }
 0x268   : > { %v1312_v46 = vpop.permute.xlu0 %1311  ;;  %2635 = vmatprep.subr.mxu0 %v4509_v0 }
 0x269   : > { %v1314_v55 = vpop.permute.xlu1 %1313 }
 0x26a   : > { %v1326_v45 = vsel %vm1319_vm13, %v1312_v46, %v1314_v55 }
 0x26b   : > { %2636 = vmatpush3.msra.mxu0 %v1326_v45  ;;  %v1161_v45 = vld [vmem:[#allocation5] sm:$0xff] }
 0x26c   : > { %v1308_v51 = vpop.permute.xlu0 %1307  ;;  %2637 = vmatprep.subr.mxu0 %v4509_v0 }
 0x26d   : > { %v1310_v48 = vpop.permute.xlu1 %1309 }
 0x26e   : > { %v1325_v33 = vsel %vm1319_vm13, %v1308_v51, %v1310_v48 }
 0x26f   : > { %2638 = vmatpush3.msra.mxu0 %v1325_v33 }
 0x270   : > { %v1304_v58 = vpop.permute.xlu0 %1303  ;;  %2639 = vmatprep.subr.mxu0 %v4509_v0 }
 0x271   : > { %v1306_v44 = vpop.permute.xlu1 %1305 }
 0x272   : > { %v1324_v60 = vsel %vm1319_vm13, %v1304_v58, %v1306_v44 }
 0x273   : > { %2640 = vmatpush3.msra.mxu0 %v1324_v60 }
 0x274   : > { %v1302_v42 = vpop.permute.xlu0 %1301  ;;  %2641 = vmatprep.subr.mxu0 %v4509_v0 }
 0x275   : > { %2642 = vmatpush3.msra.mxu0 %v1302_v42  ;;  %v1298_v8 = vpop.permute.xlu1 %1297 }
 0x276   : > { %2643 = vmatprep.subr.mxu0 %v4509_v0 }
 0x278   : > { %v1300_v47 = vpop.permute.xlu0 %1299 }
 0x279   : > { %v1323_v41 = vsel %vm1319_vm13, %v1298_v8, %v1300_v47  ;;  %v1294_v54 = vpop.permute.xlu1 %1293 }
 0x27a   : > { %2644 = vmatpush3.msra.mxu0 %v1323_v41 }
 0x27b   : > { %2645 = vmatprep.subr.mxu0 %v4509_v0 }
 0x27c   : > { %v1296_v57 = vpop.permute.xlu0 %1295 }
 0x27d   : > { %v1322_v27 = vsel %vm1319_vm13, %v1294_v54, %v1296_v57  ;;  %v1290_v23 = vpop.permute.xlu1 %1289 }
 0x27e   : > { %2646 = vmatpush3.msra.mxu0 %v1322_v27 }
 0x27f   : > { %2647 = vmatprep.subr.mxu0 %v4509_v0 }
 0x280   : > { %v1292_v11 = vpop.permute.xlu0 %1291 }
 0x281   : > { %v1321_v26 = vsel %vm1319_vm13, %v1290_v23, %v1292_v11  ;;  %v3965_v46 = vpop.permute.xlu1 %1285 }
 0x282   : > { %2648 = vmatpush3.msra.mxu0 %v1321_v26 }
 0x283   : > { %2649 = vmatprep.subr.mxu0 %v4509_v0 }
 0x284   : > { %v1288_v55 = vpop.permute.xlu0 %1287 }
 0x285   : > { %v1320_v51 = vsel %vm1319_vm13, %v3965_v46, %v1288_v55 }
 0x286   : > { %2650 = vmatpush3.msra.mxu0 %v1320_v51 }
 0x287   : > { %2652 = vmatmul.mubr.msk.f32.vlgmr.msra.gmra.mxu0 %vm1014_vm11, %v1161_v45  ;;  %2588 = vmatprep.subr.mxu0 %v3445_v1  ;;  %v4510_v1 = vld [vmem:[#allocation32_spill] sm:$0xff] }
 0x288   : > { %2589 = vmatpush3.msra.mxu0 %v3447_v2  ;;  %v4511_v2 = vld [vmem:[#allocation33_spill] sm:$0xff] }
 0x289   : > { %2590 = vmatprep.subr.mxu0 %v3449_v3  ;;  %v4512_v3 = vld [vmem:[#allocation34_spill] sm:$0xff] }
 0x28a   : > { %2591 = vmatpush3.msra.mxu0 %v3452_v4  ;;  %v4513_v4 = vld [vmem:[#allocation35_spill] sm:$0xff] }
 0x28b   : > { %2592 = vmatprep.subr.mxu0 %v3458_v5  ;;  %v4514_v5 = vld [vmem:[#allocation36_spill] sm:$0xff] }
 0x28c   : > { %2593 = vmatpush3.msra.mxu0 %v3461_v6  ;;  %v4515_v6 = vld [vmem:[#allocation37_spill] sm:$0xff] }
 0x28d   : > { %2594 = vmatprep.subr.mxu0 %v3464_v7  ;;  %v4516_v7 = vld [vmem:[#allocation38_spill] sm:$0xff] }
 0x28e   : > { %2595 = vmatpush3.msra.mxu0 %v3469_v9  ;;  %v4517_v9 = vld [vmem:[#allocation39_spill] sm:$0xff]  ;;  %v1266_v44 = vpop.permute.xlu1 %1265 }
 0x28f   : > { %2596 = vmatprep.subr.mxu0 %v3474_v10  ;;  %v4518_v10 = vld [vmem:[#allocation40_spill] sm:$0xff] }
 0x290   : > { %2597 = vmatpush3.msra.mxu0 %v3479_v12  ;;  %v4519_v12 = vld [vmem:[#allocation41_spill] sm:$0xff] }
 0x291   : > { %2598 = vmatprep.subr.mxu0 %v3483_v13  ;;  %v4520_v13 = vld [vmem:[#allocation42_spill] sm:$0xff] }
 0x292   : > { %2599 = vmatpush3.msra.mxu0 %v3486_v14  ;;  %v4521_v14 = vld [vmem:[#allocation43_spill] sm:$0xff] }
 0x293   : > { %2600 = vmatprep.subr.mxu0 %v3491_v15  ;;  %v4522_v15 = vld [vmem:[#allocation44_spill] sm:$0xff] }
 0x294   : > { %2601 = vmatpush3.msra.mxu0 %v3494_v17  ;;  %v4523_v17 = vld [vmem:[#allocation45_spill] sm:$0xff] }
 0x295   : > { %2602 = vmatprep.subr.mxu0 %v3497_v18  ;;  %v894_v18 = vpop.permute.xlu0 %893 }
 0x296   : > { %2603 = vmatpush3.msra.mxu0 %v3500_v19 }
 0x297   : > { %2604 = vmatprep.subr.mxu0 %v3504_v21 }
 0x298   : > { %2605 = vmatpush3.msra.mxu0 %v3508_v22 }
 0x299   : > { %2606 = vmatprep.subr.mxu0 %v4510_v1 }
 0x29a   : > { %2607 = vmatpush3.msra.mxu0 %v4511_v2 }
 0x29b   : > { %2608 = vmatprep.subr.mxu0 %v4512_v3 }
 0x29c   : > { %2609 = vmatpush3.msra.mxu0 %v4513_v4 }
 0x29d   : > { %2610 = vmatprep.subr.mxu0 %v4514_v5 }
 0x29e   : > { %2611 = vmatpush3.msra.mxu0 %v4515_v6 }
 0x29f   : > { %2612 = vmatprep.subr.mxu0 %v4516_v7 }
 0x2a0   : > { %2613 = vmatpush3.msra.mxu0 %v4517_v9 }
 0x2a1   : > { %2614 = vmatprep.subr.mxu0 %v4518_v10 }
 0x2a2   : > { %2615 = vmatpush3.msra.mxu0 %v4519_v12 }
 0x2a3   : > { %2616 = vmatprep.subr.mxu0 %v4520_v13 }
 0x2a4   : > { %2617 = vmatpush3.msra.mxu0 %v4521_v14 }
 0x2a5   : > { %2618 = vmatprep.subr.mxu0 %v4522_v15 }
 0x2a6   : > { %2619 = vmatpush3.msra.mxu0 %v4523_v17 }
 0x2e3   : > { %v1084_v19 = vpop.f32.mrf.mxu0 }
 0x2e4   : > { %v1085_v21 = vadd.f32 %v1084_v19, %v894_v18  ;;  %v1511_v19 = vld [vmem:[#allocation7] sm:$0xff] }
 0x2e5   : > { %v1086_v22 = vpop.f32.mrf.mxu0  ;;  %2672 = vmatprep.mubr.msk.f32.mxu1 %vm1014_vm11, %v1511_v19  ;;  %v1512_v19 = vld [vmem:[#allocation7 + $0x8] sm:$0xff] }
 0x2e6   : > { %v1087_v48 = vadd.f32 %v1086_v22, %v894_v18  ;;  %v4004_v58 = vmax.f32 %v1085_v21, 0.0 }
 0x2e8   : > { %v4002_v33 = vmax.f32 %v1087_v48, 0.0 }
 0x2ea   : > { %1778 = vmatprep.mubr.f32.mxu0 %v4002_v33 }
 0x2eb   : > { %1779 = vmatmul.mubr.f32.vlgmr.msra.gmra.mxu0 %v4004_v58 }
 0x2ec   : > { %2124 = vmatprep.mubr.f32.mxu0 %v4509_v0 }
 0x347   : > { %v1406_v60 = vpop.f32.mrf.mxu0 }
 0x348   : > { %v1407_v42 = vadd.f32 %v1406_v60, %v1266_v44 }
 0x349   : > { %v2653_v8 = vpop.f32.mrf.mxu0 }
 0x34a   : > { %v1410_v47 = vmax.f32 %v1407_v42, 0.0 }
 0x34c   : > { %1537 = vrot.lane.b32.xlu0 %v1410_v47, %s3181_s2  ;;  %1547 = vrot.lane.b32.xlu1 %v1410_v47, %s3180_s17  ;;  %v1552_v42 = vmul.f32 %v1410_v47, %v3795_v39 }
 0x350   : > { %1524 = vrot.lane.b32.xlu0 %v1410_v47, %s3186_s26  ;;  %1542 = vrot.lane.b32.xlu1 %v1410_v47, %s3177_s29 }
 0x354   : > { %1519 = vrot.lane.b32.xlu0 %v1410_v47, %s3182_s21  ;;  %1532 = vrot.lane.b32.xlu1 %v1410_v47, %s3185_s30 }
 0x358   : > { %1529 = vrot.lane.b32.xlu1 %v1410_v47, %s3184_s18 }
 0x35c   : > { %1514 = vrot.lane.b32.xlu1 %v1410_v47, %s3183_s23 }
 0x3ab   : > { %v2620_v8 = vpop.f32.mrf.mxu0 }
 0x3be   : > { %v1548_v41 = vpop.permute.xlu1 %1547  ;;  %v1538_v23 = vpop.permute.xlu0 %1537 }
 0x3bf   : > { %v1549_v54 = vsel %vm731_vm4, %v1548_v41, %v3690_v43  ;;  %v1566_v57 = vmul.f32 %v1548_v41, %v3746_v37  ;;  %v1539_v51 = vsel %vm710_vm5, %v1538_v23, %v3716_v59  ;;  %v1562_v2 = vmul.f32 %v1538_v23, %v3740_v40  ;;  %v2621_v41 = vpop.f32.mrf.mxu0 }
 0x3c0   : > { %v1567_v27 = vmul.f32 %v1549_v54, %v3746_v37  ;;  %v1563_v3 = vmul.f32 %v1539_v51, %v3740_v40  ;;  %v4072_v54 = vadd.f32 %v2621_v41, %v2620_v8  ;;  %v4528_v41 = vld [vmem:[#allocation47_spill] sm:$0xff] }
 0x3c1   : > { %1612 = vrot.lane.b32.xlu0 %v1566_v57, %s3189_s27 }
 0x3c2   : > { %1614 = vrot.lane.b32.xlu1 %v1567_v27, %s3189_s27  ;;  %v1543_v11 = vpop.permute.xlu1 %1542  ;;  %v1525_v4 = vpop.permute.xlu0 %1524 }
 0x3c3   : > { %v1544_v26 = vsel %vm720_vm1, %v1543_v11, %v3752_v31  ;;  %v1564_v55 = vmul.f32 %v1543_v11, %v3736_v32  ;;  %v1526_v10 = vsel %vm1177_vm10, %v3748_v36, %v1525_v4  ;;  %v1558_v18 = vmul.f32 %v1525_v4, %v3758_v30 }
 0x3c4   : > { %v1565_v45 = vmul.f32 %v1544_v26, %v3736_v32  ;;  %v1557_v14 = vmul.f32 %v1526_v10, %v3758_v30 }
 0x3c5   : > { %1608 = vrot.lane.b32.xlu0 %v1564_v55, %s3189_s27 }
 0x3c6   : > { %1610 = vrot.lane.b32.xlu1 %v1565_v45, %s3189_s27  ;;  %v1533_v1 = vpop.permute.xlu1 %1532  ;;  %v1520_v12 = vpop.permute.xlu0 %1519 }
 0x3c7   : > { %v1534_v5 = vsel %vm1188_vm9, %v1533_v1, %v3744_v38  ;;  %v1560_v6 = vmul.f32 %v1533_v1, %v3764_v29  ;;  %v1521_v15 = vsel %vm698_vm6, %v3722_v49, %v1520_v12  ;;  %v1556_v48 = vmul.f32 %v1520_v12, %v3768_v35 }
 0x3c8   : > { %v1561_v7 = vmul.f32 %v1534_v5, %v3764_v29  ;;  %v1555_v21 = vmul.f32 %v1521_v15, %v3768_v35 }
 0x3c9   : > { %1604 = vrot.lane.b32.xlu0 %v1562_v2, %s3189_s27 }
 0x3ca   : > { %1606 = vrot.lane.b32.xlu1 %v1563_v3, %s3189_s27  ;;  %v1530_v9 = vpop.permute.xlu1 %1529 }
 0x3cb   : > { %v1559_v13 = vmul.f32 %v1530_v9, %v3776_v25 }
 0x3cd   : > { %1600 = vrot.lane.b32.xlu0 %v1560_v6, %s3189_s27 }
 0x3ce   : > { %1602 = vrot.lane.b32.xlu1 %v1561_v7, %s3189_s27  ;;  %v1515_v17 = vpop.permute.xlu1 %1514 }
 0x3cf   : > { %v1516_v22 = vsel %vm686_vm8, %v3738_v20, %v1515_v17  ;;  %v1554_v60 = vmul.f32 %v1515_v17, %v3781_v50 }
 0x3d0   : > { %v1553_v44 = vmul.f32 %v1516_v22, %v3781_v50 }
 0x3d1   : > { %1598 = vrot.lane.b32.xlu0 %v1559_v13, %s3189_s27 }
 0x3d2   : > { %1594 = vrot.lane.b32.xlu1 %v1557_v14, %s3189_s27 }
 0x3d5   : > { %1596 = vrot.lane.b32.xlu0 %v1558_v18, %s3189_s27 }
 0x3d6   : > { %1590 = vrot.lane.b32.xlu1 %v1555_v21, %s3189_s27 }
 0x3d9   : > { %1592 = vrot.lane.b32.xlu0 %v1556_v48, %s3189_s27 }
 0x3da   : > { %1586 = vrot.lane.b32.xlu1 %v1553_v44, %s3189_s27  ;;  %v4526_v44 = vld [vmem:[#allocation46_spill] sm:$0xff] }
 0x3dd   : > { %1588 = vrot.lane.b32.xlu0 %v1554_v60, %s3189_s27 }
 0x3de   : > { %1584 = vrot.lane.b32.xlu1 %v1552_v42, %s3189_s27  ;;  %v4527_v42 = vld [vmem:[#allocation49_spill] sm:$0xff] }
 0x3e1   : > { %1476 = vrot.lane.b32.xlu0 %v4004_v58, %s3176_s24 }
 0x3e2   : > { %1478 = vrot.lane.b32.xlu1 %v4002_v33, %s3176_s24  ;;  %s4529_s24 = smov 17  }
 0x3e5   : > { %1467 = vrot.lane.b32.xlu0 %v4004_v58, %s4524_s16 }
 0x3e6   : > { %1469 = vrot.lane.b32.xlu1 %v4002_v33, %s4524_s16 }
 0x3e9   : > { %1819 = vrot.lane.b32.xlu0 %v4072_v54, %s3180_s17 }
 0x3ea   : > { %1458 = vrot.lane.b32.xlu1 %v4004_v58, %s4525_s25 }
 0x3ed   : > { %1460 = vrot.lane.b32.xlu0 %v4002_v33, %s4525_s25 }
 0x3ee   : > { %1814 = vrot.lane.b32.xlu1 %v4072_v54, %s3177_s29 }
 0x3f1   : > { %1449 = vrot.lane.b32.xlu0 %v4004_v58, %s3180_s17 }
 0x3f2   : > { %1451 = vrot.lane.b32.xlu1 %v4002_v33, %s3180_s17 }
 0x3f5   : > { %1809 = vrot.lane.b32.xlu0 %v4072_v54, %s3181_s2 }
 0x3f6   : > { %1441 = vrot.lane.b32.xlu1 %v4004_v58, %s3177_s29 }
 0x3f9   : > { %1443 = vrot.lane.b32.xlu0 %v4002_v33, %s3177_s29 }
 0x3fa   : > { %1804 = vrot.lane.b32.xlu1 %v4072_v54, %s3185_s30  ;;  %s4324_s30 = sand.u32 1, %s3153_s19  }
 0x3fb   : > { %s2291_s29 = scalar_lea.sflag [#allocation4], %s4324_s30 }
 0x3fd   : > { %1432 = vrot.lane.b32.xlu0 %v4004_v58, %s3181_s2 }
 0x3fe   : > { %1434 = vrot.lane.b32.xlu1 %v4002_v33, %s3181_s2  ;;  %s3191_s2 = smov [#allocation16]  }
 0x401   : > { %1423 = vrot.lane.b32.xlu0 %v4004_v58, %s3182_s21 }
 0x402   : > { %1425 = vrot.lane.b32.xlu1 %v4002_v33, %s3182_s21 }
 0x405   : > { %1796 = vrot.lane.b32.xlu0 %v4072_v54, %s3186_s26  ;;  %s2513_s26 = sshll.u32 %s4324_s30, 4 }
 0x406   : > { %1801 = vrot.lane.b32.xlu1 %v4072_v54, %s3184_s18 }
 0x409   : > { %1414 = vrot.lane.b32.xlu0 %v4004_v58, %s3183_s23 }
 0x40a   : > { %1416 = vrot.lane.b32.xlu1 %v4002_v33, %s3183_s23 }
 0x40d   : > { %1791 = vrot.lane.b32.xlu0 %v4072_v54, %s3182_s21  ;;  %s3055_s21 = sshll.u32 %s3191_s2, 4  ;;  %s3056_s21 = int_to_ptr.vmem [resolvable:$false] %s3055_s21 }
 0x40e   : > { %1786 = vrot.lane.b32.xlu1 %v4072_v54, %s3183_s23  ;;  %s3057_s23 = scalar_lea.vmem %s3056_s21, 512 }
 0x433   : > { %v1613_v47 = vpop.permute.xlu0 %1612 }
 0x434   : > { %v1615_v57 = vpop.permute.xlu1 %1614 }
 0x435   : > { %v1623_v27 = vsel %vm1319_vm13, %v1613_v47, %v1615_v57 }
 0x436   : > { %2654 = vmatprep.subr.mxu1 %v1623_v27 }
 0x437   : > { %v1609_v23 = vpop.permute.xlu0 %1608  ;;  %2655 = vmatpush3.msra.mxu1 %v1623_v27 }
 0x438   : > { %v1611_v11 = vpop.permute.xlu1 %1610 }
 0x439   : > { %v1622_v26 = vsel %vm1319_vm13, %v1609_v23, %v1611_v11  ;;  %v4530_v11 = vld [vmem:[#allocation48_spill] sm:$0xff] }
 0x43a   : > { %2656 = vmatprep.subr.mxu1 %v1622_v26 }
 0x43b   : > { %v1605_v55 = vpop.permute.xlu0 %1604  ;;  %2657 = vmatpush3.msra.mxu1 %v1622_v26 }
 0x43c   : > { %v1607_v45 = vpop.permute.xlu1 %1606 }
 0x43d   : > { %v1621_v51 = vsel %vm1319_vm13, %v1605_v55, %v1607_v45  ;;  %v4531_v55 = vld [vmem:[#allocation53_spill] sm:$0xff] }
 0x43e   : > { %2658 = vmatprep.subr.mxu1 %v1621_v51 }
 0x43f   : > { %v1601_v1 = vpop.permute.xlu0 %1600  ;;  %2659 = vmatpush3.msra.mxu1 %v1621_v51  ;;  %v4532_v51 = vld [vmem:[#allocation51_spill] sm:$0xff] }
 0x440   : > { %v1603_v2 = vpop.permute.xlu1 %1602 }
 0x441   : > { %v1620_v3 = vsel %vm1319_vm13, %v1601_v1, %v1603_v2 }
 0x442   : > { %2660 = vmatprep.subr.mxu1 %v1620_v3 }
 0x443   : > { %v1599_v4 = vpop.permute.xlu0 %1598  ;;  %2661 = vmatpush3.msra.mxu1 %v1620_v3 }
 0x444   : > { %2662 = vmatprep.subr.mxu1 %v1599_v4  ;;  %v1595_v5 = vpop.permute.xlu1 %1594 }
 0x445   : > { %2663 = vmatpush3.msra.mxu1 %v1599_v4  ;;  %v4533_v4 = vld [vmem:[#allocation50_spill] sm:$0xff] }
 0x447   : > { %v1597_v6 = vpop.permute.xlu0 %1596 }
 0x448   : > { %v1591_v7 = vpop.permute.xlu1 %1590  ;;  %v1619_v9 = vsel %vm1319_vm13, %v1595_v5, %v1597_v6  ;;  %v4534_v6 = vld [vmem:[#allocation52_spill] sm:$0xff] }
 0x449   : > { %2664 = vmatprep.subr.mxu1 %v1619_v9 }
 0x44a   : > { %2665 = vmatpush3.msra.mxu1 %v1619_v9 }
 0x44b   : > { %v1593_v10 = vpop.permute.xlu0 %1592 }
 0x44c   : > { %v1587_v12 = vpop.permute.xlu1 %1586  ;;  %v1618_v13 = vsel %vm1319_vm13, %v1591_v7, %v1593_v10 }
 0x44d   : > { %2666 = vmatprep.subr.mxu1 %v1618_v13 }
 0x44e   : > { %2667 = vmatpush3.msra.mxu1 %v1618_v13 }
 0x44f   : > { %v1589_v14 = vpop.permute.xlu0 %1588 }
 0x450   : > { %v1585_v15 = vpop.permute.xlu1 %1584  ;;  %v1617_v17 = vsel %vm1319_vm13, %v1587_v12, %v1589_v14  ;;  %v4535_v12 = vld [vmem:[#allocation54_spill] sm:$0xff] }
 0x451   : > { %2668 = vmatprep.subr.mxu1 %v1617_v17  ;;  %v1616_v18 = vsel %vm1319_vm13, %v3965_v46, %v1585_v15  ;;  %v4536_v15 = vld [vmem:[#allocation57_spill] sm:$0xff] }
 0x452   : > { %2669 = vmatpush3.msra.mxu1 %v1617_v17 }
 0x453   : > { %v1477_v21 = vpop.permute.xlu0 %1476  ;;  %2670 = vmatprep.subr.mxu1 %v1616_v18 }
 0x454   : > { %2671 = vmatpush3.msra.mxu1 %v1616_v18  ;;  %v1479_v22 = vpop.permute.xlu1 %1478  ;;  %v1508_v26 = vmul.f32 %v1477_v21, %v4530_v11  ;;  %v4537_v18 = vld [vmem:[#allocation55_spill] sm:$0xff] }
 0x455   : > { %v1480_v48 = vsel %vm767_vm0, %v1477_v21, %v1479_v22  ;;  %v1481_v60 = vsel %vm767_vm0, %v1479_v22, %v4526_v44  ;;  %2673 = vmatmul.mubr.msk.f32.vlgmr.msra.gmra.mxu1 %vm1014_vm11, %v1512_v19  ;;  %v4538_v44 = vld [vmem:[#allocation56_spill] sm:$0xff]  ;;  %v4541_v11 = vld [vmem:[#allocation59_spill] sm:$0xff] }
 0x456   : > { %v1509_v8 = vmul.f32 %v1480_v48, %v4527_v42  ;;  %v1510_v47 = vmul.f32 %v1481_v60, %v4528_v41  ;;  %1936 = vmatprep.mubr.f32.mxu1 %v4509_v0  ;;  %v4539_v42 = vld [vmem:[#allocation60_spill] sm:$0xff] }
 0x457   : > { %v1468_v57 = vpop.permute.xlu0 %1467 }
 0x458   : > { %2019 = vrot.lane.b32.xlu1 %v1510_v47, %s4529_s24  ;;  %2017 = vrot.lane.b32.xlu0 %v1509_v8, %s4529_s24  ;;  %v1470_v27 = vpop.permute.xlu1 %1469  ;;  %v1505_v5 = vmul.f32 %v1468_v57, %v4533_v4  ;;  %v4543_v4 = vld [vmem:[#allocation62_spill] sm:$0xff] }
 0x459   : > { %v1471_v23 = vsel %vm755_vm2, %v1468_v57, %v1470_v27  ;;  %v1472_v1 = vsel %vm755_vm2, %v1470_v27, %v4532_v51  ;;  %v4540_v27 = vld [vmem:[#allocation58_spill] sm:$0xff] }
 0x45a   : > { %v1506_v45 = vmul.f32 %v1471_v23, %v4531_v55  ;;  %v1507_v7 = vmul.f32 %v1472_v1, %v4534_v6  ;;  %v4542_v1 = vld [vmem:[#allocation64_spill] sm:$0xff] }
 0x45b   : > { %v4137_v2 = vpop.permute.xlu0 %1819 }
 0x45c   : > { %2015 = vrot.lane.b32.xlu0 %v1508_v26, %s4529_s24  ;;  %2011 = vrot.lane.b32.xlu1 %v1506_v45, %s4529_s24  ;;  %v1459_v3 = vpop.permute.xlu1 %1458 }
 0x45d   : > { %v1502_v60 = vmul.f32 %v1459_v3, %v4538_v44  ;;  %v1871_v44 = vld [vmem:[#allocation11 + $0xf8] sm:$0xff] }
 0x45e   : > { %1872 = vmatprep.subr.mxu1 %v1871_v44  ;;  %v1851_v44 = vld [vmem:[#allocation11 + $0x58] sm:$0xff] }
 0x45f   : > { %v1461_v9 = vpop.permute.xlu0 %1460 }
 0x460   : > { %v1462_v10 = vsel %vm743_vm3, %v1459_v3, %v1461_v9  ;;  %v1463_v13 = vsel %vm743_vm3, %v1461_v9, %v4535_v12  ;;  %2013 = vrot.lane.b32.xlu0 %v1507_v7, %s4529_s24  ;;  %2009 = vrot.lane.b32.xlu1 %v1505_v5, %s4529_s24  ;;  %v4148_v14 = vpop.permute.xlu1 %1814 }
 0x461   : > { %v1503_v17 = vmul.f32 %v1462_v10, %v4536_v15  ;;  %v1504_v19 = vmul.f32 %v1463_v13, %v4537_v18  ;;  %v4544_v10 = vld [vmem:[#allocation61_spill] sm:$0xff] }
 0x462   : > { %v4545_v13 = vld [vmem:[#allocation65_spill] sm:$0xff] }
 0x463   : > { %v1450_v21 = vpop.permute.xlu0 %1449 }
 0x464   : > { %2007 = vrot.lane.b32.xlu1 %v1504_v19, %s4529_s24  ;;  %2005 = vrot.lane.b32.xlu0 %v1503_v17, %s4529_s24  ;;  %v1452_v22 = vpop.permute.xlu1 %1451  ;;  %v1499_v23 = vmul.f32 %v1450_v21, %v4540_v27  ;;  %v1868_v27 = vld [vmem:[#allocation11 + $0xe0] sm:$0xff] }
 0x465   : > { %v1453_v48 = vsel %vm731_vm4, %v1450_v21, %v1452_v22  ;;  %v1454_v41 = vsel %vm731_vm4, %v1452_v22, %v3690_v43  ;;  %v4546_v22 = vld [vmem:[#allocation63_spill] sm:$0xff] }
 0x466   : > { %v1500_v8 = vmul.f32 %v1453_v48, %v4539_v42  ;;  %v1501_v26 = vmul.f32 %v1454_v41, %v4541_v11  ;;  %v1867_v11 = vld [vmem:[#allocation11 + $0xd8] sm:$0xff] }
 0x467   : > { %v4159_v47 = vpop.permute.xlu0 %1809 }
 0x468   : > { %2003 = vrot.lane.b32.xlu0 %v1502_v60, %s4529_s24  ;;  %1999 = vrot.lane.b32.xlu1 %v1500_v8, %s4529_s24  ;;  %v1442_v57 = vpop.permute.xlu1 %1441  ;;  %v1870_v8 = vld [vmem:[#allocation11 + $0xf0] sm:$0xff] }
 0x469   : > { %v1496_v12 = vmul.f32 %v1442_v57, %v4544_v10  ;;  %1873 = vmatpush1.msra.mxu1 %v1870_v8 }
 0x46b   : > { %v1444_v55 = vpop.permute.xlu0 %1443 }
 0x46c   : > { %v1445_v45 = vsel %vm720_vm1, %v1442_v57, %v1444_v55  ;;  %2001 = vrot.lane.b32.xlu0 %v1501_v26, %s4529_s24  ;;  %1997 = vrot.lane.b32.xlu1 %v1499_v23, %s4529_s24  ;;  %v4168_v51 = vpop.permute.xlu1 %1804  ;;  %v1498_v5 = vmul.f32 %v1444_v55, %v4543_v4  ;;  %v1869_v57 = vld [vmem:[#allocation11 + $0xe8] sm:$0xff] }
 0x46d   : > { %v1497_v3 = vmul.f32 %v1445_v45, %v4542_v1  ;;  %1874 = vmatprep.subr.mxu1 %v1869_v57  ;;  %v1866_v45 = vld [vmem:[#allocation11 + $0xd0] sm:$0xff] }
 0x46e   : > { %1875 = vmatpush1.msra.mxu1 %v1868_v27  ;;  %v1849_v27 = vld [vmem:[#allocation11 + $0x48] sm:$0xff] }
 0x46f   : > { %v1433_v6 = vpop.permute.xlu0 %1432  ;;  %1876 = vmatprep.subr.mxu1 %v1867_v11  ;;  %v1848_v11 = vld [vmem:[#allocation11 + $0x40] sm:$0xff] }
 0x470   : > { %1995 = vrot.lane.b32.xlu1 %v1498_v5, %s4529_s24  ;;  %1993 = vrot.lane.b32.xlu0 %v1497_v3, %s4529_s24  ;;  %v1435_v7 = vpop.permute.xlu1 %1434  ;;  %v1436_v17 = vsel %vm710_vm5, %v3716_v59, %v1433_v6  ;;  %v1865_v3 = vld [vmem:[#allocation11 + $0xc8] sm:$0xff]  ;;  %v1864_v5 = vld [vmem:[#allocation11 + $0xc0] sm:$0xff] }
 0x471   : > { %v1437_v9 = vsel %vm710_vm5, %v1433_v6, %v1435_v7  ;;  %v1493_v21 = vmul.f32 %v1436_v17, %v3710_v62  ;;  %v1495_v48 = vmul.f32 %v1435_v7, %v4546_v22  ;;  %1877 = vmatpush1.msra.mxu1 %v1866_v45  ;;  %v1863_v7 = vld [vmem:[#allocation11 + $0xb8] sm:$0xff]  ;;  %v1486_v17 = vmul.f32 %v4002_v33, %v3742_v63  ;;  %v1854_v63 = vld [vmem:[#allocation11 + $0x70] sm:$0xff]  ;;  %v1853_v33 = vld [vmem:[#allocation11 + $0x68] sm:$0xff] }
 0x472   : > { %v1494_v15 = vmul.f32 %v1437_v9, %v4545_v13  ;;  %1878 = vmatprep.subr.mxu1 %v1865_v3  ;;  %v1862_v9 = vld [vmem:[#allocation11 + $0xb0] sm:$0xff]  ;;  %v1859_v13 = vld [vmem:[#allocation11 + $0x98] sm:$0xff]  ;;  %v1832_v22 = vmul.f32 %v4168_v51, %v3764_v29 }
 0x473   : > { %v1424_v18 = vpop.permute.xlu0 %1423  ;;  %1879 = vmatpush1.msra.mxu1 %v1864_v5 }
 0x474   : > { %1991 = vrot.lane.b32.xlu0 %v1496_v12, %s4529_s24  ;;  %1987 = vrot.lane.b32.xlu1 %v1494_v15, %s4529_s24  ;;  %v1426_v19 = vpop.permute.xlu1 %1425  ;;  %v1427_v26 = vsel %vm698_vm6, %v3722_v49, %v1424_v18  ;;  %v1485_v15 = vmul.f32 %v4004_v58, %v3857_v61  ;;  %v1855_v61 = vld [vmem:[#allocation11 + $0x78] sm:$0xff]  ;;  %v1834_v58 = vmul.f32 %v4159_v47, %v3740_v40 }
 0x475   : > { %v1428_v60 = vsel %vm698_vm6, %v1424_v18, %v1426_v19  ;;  %v1492_v23 = vmul.f32 %v1426_v19, %v3726_v56  ;;  %1880 = vmatprep.subr.mxu1 %v1863_v7  ;;  %v1856_v18 = vld [vmem:[#allocation11 + $0x80] sm:$0xff]  ;;  %v1838_v19 = vmul.f32 %v4137_v2, %v3746_v37 }
 0x476   : > { %v1491_v62 = vmul.f32 %v1428_v60, %v3823_v24  ;;  %v1490_v24 = vmul.f32 %v1427_v26, %v3718_v16  ;;  %v1861_v16 = vld [vmem:[#allocation11 + $0xa8] sm:$0xff]  ;;  %1881 = vmatpush1.msra.mxu1 %v1862_v9  ;;  %v1850_v60 = vld [vmem:[#allocation11 + $0x50] sm:$0xff]  ;;  %v1847_v26 = vld [vmem:[#allocation11 + $0x38] sm:$0xff] }
 0x477   : > { %v4184_v42 = vpop.permute.xlu0 %1796  ;;  %1882 = vmatprep.subr.mxu1 %v1861_v16 }
 0x478   : > { %1989 = vrot.lane.b32.xlu0 %v1495_v48, %s4529_s24  ;;  %1985 = vrot.lane.b32.xlu1 %v1493_v21, %s4529_s24  ;;  %v4188_v41 = vpop.permute.xlu1 %1801  ;;  %v1836_v21 = vmul.f32 %v4148_v14, %v3736_v32  ;;  %v1852_v48 = vld [vmem:[#allocation11 + $0x60] sm:$0xff]  ;;  %v1830_v8 = vmul.f32 %v4184_v42, %v3758_v30 }
 0x479   : > { %v1831_v57 = vmul.f32 %v4188_v41, %v3776_v25  ;;  %v1846_v25 = vld [vmem:[#allocation11 + $0x30] sm:$0xff]  ;;  %v1816_v41 = vsel %vm720_vm1, %v4148_v14, %v3752_v31  ;;  %v1806_v31 = vsel %vm1188_vm9, %v4168_v51, %v3744_v38  ;;  %v1798_v38 = vsel %vm1177_vm10, %v3748_v36, %v4184_v42 }
 0x47a   : > { %v1842_v14 = vld [vmem:[#allocation11 + $0x10] sm:$0xff]  ;;  %v1829_v51 = vmul.f32 %v1798_v38, %v3758_v30  ;;  %v2131_v30 = vld [vmem:[%s4392_s12] sm:$0xff] }
 0x47b   : > { %v1415_v55 = vpop.permute.xlu0 %1414 }
 0x47c   : > { %1983 = vrot.lane.b32.xlu1 %v1492_v23, %s4529_s24  ;;  %1981 = vrot.lane.b32.xlu0 %v1491_v62, %s4529_s24  ;;  %v1417_v1 = vpop.permute.xlu1 %1416  ;;  %v1418_v6 = vsel %vm686_vm8, %v3738_v20, %v1415_v55  ;;  %v1821_v62 = vsel %vm731_vm4, %v4137_v2, %v3690_v43  ;;  %v1811_v43 = vsel %vm710_vm5, %v4159_v47, %v3716_v59  ;;  %v1845_v2 = vld [vmem:[#allocation11 + $0x28] sm:$0xff] }
 0x47d   : > { %v1419_v4 = vsel %vm686_vm8, %v1415_v55, %v1417_v1  ;;  %v1487_v10 = vmul.f32 %v1418_v6, %v3734_v53  ;;  %v1489_v12 = vmul.f32 %v1417_v1, %v3728_v52  ;;  %v1858_v53 = vld [vmem:[#allocation11 + $0x90] sm:$0xff]  ;;  %v1857_v52 = vld [vmem:[#allocation11 + $0x88] sm:$0xff]  ;;  %v1839_v55 = vmul.f32 %v1821_v62, %v3746_v37  ;;  %v1844_v1 = vld [vmem:[#allocation11 + $0x20] sm:$0xff] }
 0x47e   : > { %v1488_v56 = vmul.f32 %v1419_v4, %v3847_v28  ;;  %v1860_v28 = vld [vmem:[#allocation11 + $0xa0] sm:$0xff]  ;;  %v1837_v37 = vmul.f32 %v1816_v41, %v3736_v32  ;;  %v1835_v3 = vmul.f32 %v1811_v43, %v3740_v40  ;;  %v1843_v4 = vld [vmem:[#allocation11 + $0x18] sm:$0xff]  ;;  %v1833_v32 = vmul.f32 %v1806_v31, %v3764_v29 }
 0x47f   : > { %1883 = vmatpush1.msra.mxu1 %v1860_v28  ;;  %v1792_v23 = vpop.permute.xlu0 %1791 }
 0x480   : > { %1979 = vrot.lane.b32.xlu1 %v1490_v24, %s4529_s24  ;;  %1975 = vrot.lane.b32.xlu0 %v1488_v56, %s4529_s24  ;;  %v1828_v45 = vmul.f32 %v1792_v23, %v3768_v35  ;;  %v1793_v59 = vsel %vm698_vm6, %v3722_v49, %v1792_v23  ;;  %v1787_v47 = vpop.permute.xlu1 %1786  ;;  %v1841_v24 = vld [vmem:[#allocation11 + $0x8] sm:$0xff]  ;;  %v1840_v56 = vld [vmem:[#allocation11] sm:$0xff] }
 0x481   : > { %1884 = vmatprep.subr.mxu1 %v1859_v13  ;;  %v1827_v40 = vmul.f32 %v1793_v59, %v3768_v35  ;;  %v1788_v49 = vsel %vm686_vm8, %v3738_v20, %v1787_v47  ;;  %v1826_v36 = vmul.f32 %v1787_v47, %v3781_v50  ;;  %v1824_v20 = vmul.f32 %v4072_v54, %v3795_v39  ;;  %v2281_v35 = vld [vmem:[%s4393_s13] sm:$0xff] }
 0x482   : > { %1885 = vmatpush1.msra.mxu1 %v1858_v53  ;;  %v1825_v29 = vmul.f32 %v1788_v49, %v3781_v50 }
 0x483   : > { %1886 = vmatprep.subr.mxu1 %v1857_v52 }
 0x484   : > { %1977 = vrot.lane.b32.xlu1 %v1489_v12, %s4529_s24  ;;  %1973 = vrot.lane.b32.xlu0 %v1487_v10, %s4529_s24 }
 0x485   : > { %1887 = vmatpush1.msra.mxu1 %v1856_v18 }
 0x486   : > { %1888 = vmatprep.subr.mxu1 %v1855_v61 }
 0x487   : > { %1889 = vmatpush1.msra.mxu1 %v1854_v63 }
 0x488   : > { %1969 = vrot.lane.b32.xlu1 %v1485_v15, %s4529_s24  ;;  %1971 = vrot.lane.b32.xlu0 %v1486_v17, %s4529_s24  ;;  %s2308_s24 = scalar_lea.hbm %s4394_s14, %s2531_s5 }
 0x489   : > { %1890 = vmatprep.subr.mxu1 %v1853_v33 }
 0x48a   : > { %1891 = vmatpush1.msra.mxu1 %v1852_v48 }
 0x48b   : > { %1892 = vmatprep.subr.mxu1 %v1851_v44 }
 0x48c   : > { %2183 = vrot.lane.b32.xlu1 %v1836_v21, %s3189_s27  ;;  %2187 = vrot.lane.b32.xlu0 %v1838_v19, %s3189_s27 }
 0x48d   : > { %1893 = vmatpush1.msra.mxu1 %v1850_v60 }
 0x48e   : > { %1894 = vmatprep.subr.mxu1 %v1849_v27 }
 0x48f   : > { %1895 = vmatpush1.msra.mxu1 %v1848_v11 }
 0x490   : > { %2175 = vrot.lane.b32.xlu1 %v1832_v22, %s3189_s27  ;;  %2179 = vrot.lane.b32.xlu0 %v1834_v58, %s3189_s27 }
 0x491   : > { %1896 = vmatprep.subr.mxu1 %v1847_v26 }
 0x492   : > { %1897 = vmatpush1.msra.mxu1 %v1846_v25 }
 0x493   : > { %1898 = vmatprep.subr.mxu1 %v1845_v2 }
 0x494   : > { %2171 = vrot.lane.b32.xlu1 %v1830_v8, %s3189_s27  ;;  %2173 = vrot.lane.b32.xlu0 %v1831_v57, %s3189_s27 }
 0x495   : > { %1899 = vmatpush1.msra.mxu1 %v1844_v1 }
 0x496   : > { %1900 = vmatprep.subr.mxu1 %v1843_v4  ;;  %v1411_v4 = vld [vmem:[%s4383_s3] sm:$0xff] }
 0x497   : > { %1901 = vmatpush1.msra.mxu1 %v1842_v14 }
 0x498   : > { %2189 = vrot.lane.b32.xlu1 %v1839_v55, %s3189_s27  ;;  %2167 = vrot.lane.b32.xlu0 %v1828_v45, %s3189_s27 }
 0x499   : > { %1902 = vmatprep.subr.mxu1 %v1841_v24 }
 0x49a   : > { %1903 = vmatpush1.msra.mxu1 %v1840_v56 }
 0x49b   : > { %2675 = vmatprep.subr.mxu1 %v4509_v0 }
 0x49c   : > { %2181 = vrot.lane.b32.xlu1 %v1835_v3, %s3189_s27  ;;  %2185 = vrot.lane.b32.xlu0 %v1837_v37, %s3189_s27 }
 0x4a0   : > { %2165 = vrot.lane.b32.xlu1 %v1827_v40, %s3189_s27  ;;  %2177 = vrot.lane.b32.xlu0 %v1833_v32, %s3189_s27 }
 0x4a4   : > { %2169 = vrot.lane.b32.xlu0 %v1829_v51, %s3189_s27  ;;  %2161 = vrot.lane.b32.xlu1 %v1825_v29, %s3189_s27 }
 0x4a8   : > { %2163 = vrot.lane.b32.xlu0 %v1826_v36, %s3189_s27  ;;  %2159 = vrot.lane.b32.xlu1 %v1824_v20, %s3189_s27  ;;  %s602_s27 = scalar_lea.vmem [#allocation16], %s2513_s26 }
 0x4a9   : > { %s2310_s20 = sshll.u32 %s602_s27, 4  ;;  %s2311_s20 = int_to_ptr.vmem [resolvable:$true] %s2310_s20 }
 0x4aa   : > { %s3051_s17 = scalar_lea.vmem %s2311_s20, 256  ;;  %p3058_p7 = scmp.lt.s32.totalorder %s2311_s20, %s3056_s21 }
 0x4ab   : > { %p3052_p5 = scmp.ne.s32.totalorder %s2311_s20, %s3051_s17  ;;  %p3059_p8 = scmp.lt.s32.totalorder %s3057_s23, %s3051_s17 }
 0x4ac   : > { %2134 = vperm.xlu0 %2842, %v2131_v30   ;;  %2284 = vperm.xlu1 %2841, %v2281_v35  }
 0x4ad   : > { %p3053_p10 = pnand %p3052_p5, %p4547_p6  ;;  %p3060_p11 = por %p3059_p8, %p3058_p7 }
 0x4af   : > { %p3054_p13 = pneg %p3053_p10 }
 0x4b1   : > { %p3061_p0 = pnand %p3060_p11, %p3054_p13 }
 0x4ca   : > { %v2018_v42 = vpop.permute.xlu0 %2017  ;;  %v2020_v5 = vpop.permute.xlu1 %2019 }
 0x4cb   : > { %v2038_v50 = vsel %vm977_vm7, %v2018_v42, %v2020_v5 }
 0x4cc   : > { %2074 = vmatprep.subr.mxu0 %v2038_v50 }
 0x4ce   : > { %v2016_v39 = vpop.permute.xlu0 %2015  ;;  %v2012_v54 = vpop.permute.xlu1 %2011 }
 0x4cf   : > { %v2037_v6 = vsel %vm977_vm7, %v2016_v39, %v2018_v42 }
 0x4d0   : > { %2075 = vmatpush1.msra.mxu0 %v2037_v6 }
 0x4d2   : > { %v2014_v7 = vpop.permute.xlu0 %2013  ;;  %v2010_v9 = vpop.permute.xlu1 %2009 }
 0x4d3   : > { %v2035_v10 = vsel %vm977_vm7, %v2010_v9, %v2012_v54  ;;  %v2036_v12 = vsel %vm977_vm7, %v2012_v54, %v2014_v7 }
 0x4d4   : > { %2076 = vmatprep.subr.mxu0 %v2036_v12 }
 0x4d5   : > { %2077 = vmatpush1.msra.mxu0 %v2035_v10  ;;  %v1784_v10 = vld [vmem:[#allocation8] sm:$0xff] }
 0x4d6   : > { %v2006_v16 = vpop.permute.xlu0 %2005  ;;  %v2008_v28 = vpop.permute.xlu1 %2007 }
 0x4d7   : > { %v2034_v13 = vsel %vm977_vm7, %v2006_v16, %v2008_v28 }
 0x4d8   : > { %2078 = vmatprep.subr.mxu0 %v2034_v13 }
 0x4da   : > { %v2004_v15 = vpop.permute.xlu0 %2003  ;;  %v2000_v17 = vpop.permute.xlu1 %1999 }
 0x4db   : > { %v2033_v53 = vsel %vm977_vm7, %v2004_v15, %v2006_v16 }
 0x4dc   : > { %2079 = vmatpush1.msra.mxu0 %v2033_v53 }
 0x4de   : > { %v2002_v52 = vpop.permute.xlu0 %2001  ;;  %v1998_v18 = vpop.permute.xlu1 %1997 }
 0x4df   : > { %v2031_v19 = vsel %vm977_vm7, %v1998_v18, %v2000_v17  ;;  %v2032_v21 = vsel %vm977_vm7, %v2000_v17, %v2002_v52 }
 0x4e0   : > { %2080 = vmatprep.subr.mxu0 %v2032_v21 }
 0x4e1   : > { %2081 = vmatpush1.msra.mxu0 %v2031_v19 }
 0x4e2   : > { %v1994_v61 = vpop.permute.xlu0 %1993  ;;  %v1996_v63 = vpop.permute.xlu1 %1995 }
 0x4e3   : > { %v2030_v33 = vsel %vm977_vm7, %v1994_v61, %v1996_v63 }
 0x4e4   : > { %2082 = vmatprep.subr.mxu0 %v2030_v33 }
 0x4e6   : > { %v1992_v58 = vpop.permute.xlu0 %1991  ;;  %v1988_v22 = vpop.permute.xlu1 %1987 }
 0x4e7   : > { %v2029_v48 = vsel %vm977_vm7, %v1992_v58, %v1994_v61 }
 0x4e8   : > { %2083 = vmatpush1.msra.mxu0 %v2029_v48 }
 0x4ea   : > { %v1990_v44 = vpop.permute.xlu0 %1989  ;;  %v1986_v60 = vpop.permute.xlu1 %1985 }
 0x4eb   : > { %v2027_v8 = vsel %vm977_vm7, %v1986_v60, %v1988_v22  ;;  %v2028_v57 = vsel %vm977_vm7, %v1988_v22, %v1990_v44 }
 0x4ec   : > { %2084 = vmatprep.subr.mxu0 %v2028_v57 }
 0x4ed   : > { %2085 = vmatpush1.msra.mxu0 %v2027_v8 }
 0x4ee   : > { %v1982_v27 = vpop.permute.xlu0 %1981  ;;  %v1984_v62 = vpop.permute.xlu1 %1983 }
 0x4ef   : > { %v2026_v23 = vsel %vm977_vm7, %v1982_v27, %v1984_v62 }
 0x4f0   : > { %2086 = vmatprep.subr.mxu0 %v2026_v23 }
 0x4f2   : > { %v1976_v11 = vpop.permute.xlu0 %1975  ;;  %v1980_v26 = vpop.permute.xlu1 %1979 }
 0x4f3   : > { %v2025_v55 = vsel %vm977_vm7, %v1980_v26, %v1982_v27 }
 0x4f4   : > { %2087 = vmatpush1.msra.mxu0 %v2025_v55 }
 0x4f6   : > { %v1974_v45 = vpop.permute.xlu0 %1973  ;;  %v1978_v25 = vpop.permute.xlu1 %1977 }
 0x4f7   : > { %v2023_v41 = vsel %vm977_vm7, %v1974_v45, %v1976_v11  ;;  %v2024_v43 = vsel %vm977_vm7, %v1976_v11, %v1978_v25 }
 0x4f8   : > { %2088 = vmatprep.subr.mxu0 %v2024_v43 }
 0x4f9   : > { %2089 = vmatpush1.msra.mxu0 %v2023_v41 }
 0x4fa   : > { %v1972_v2 = vpop.permute.xlu0 %1971  ;;  %v1970_v1 = vpop.permute.xlu1 %1969 }
 0x4fb   : > { %v2021_v37 = vsel %vm977_vm7, %v3941_v34, %v1970_v1  ;;  %v2022_v3 = vsel %vm977_vm7, %v1970_v1, %v1972_v2 }
 0x4fc   : > { %2090 = vmatprep.subr.mxu0 %v2022_v3 }
 0x4fd   : > { %2091 = vmatpush1.msra.mxu0 %v2021_v37 }
 0x4fe   : > { %v2188_v31 = vpop.permute.xlu0 %2187  ;;  %v2184_v59 = vpop.permute.xlu1 %2183  ;;  %2521 = vmatmul.mubr.msk.f32.vlgmr.msra.gmra.mxu0 %vm1014_vm11, %v1411_v4 }
 0x502   : > { %v2180_v14 = vpop.permute.xlu0 %2179  ;;  %v2176_v47 = vpop.permute.xlu1 %2175 }
 0x506   : > { %v2174_v24 = vpop.permute.xlu0 %2173  ;;  %v2172_v32 = vpop.permute.xlu1 %2171 }
 0x50a   : > { %v2168_v40 = vpop.permute.xlu0 %2167  ;;  %v2190_v56 = vpop.permute.xlu1 %2189 }
 0x50b   : > { %v2198_v36 = vsel %vm1319_vm13, %v2188_v31, %v2190_v56 }
 0x50e   : > { %v2186_v38 = vpop.permute.xlu0 %2185  ;;  %v2182_v34 = vpop.permute.xlu1 %2181 }
 0x50f   : > { %v2197_v30 = vsel %vm1319_vm13, %v2184_v59, %v2186_v38  ;;  %v2196_v35 = vsel %vm1319_vm13, %v2180_v14, %v2182_v34 }
 0x512   : > { %v2178_v51 = vpop.permute.xlu0 %2177  ;;  %v2166_v20 = vpop.permute.xlu1 %2165 }
 0x513   : > { %v2195_v5 = vsel %vm1319_vm13, %v2176_v47, %v2178_v51  ;;  %v2193_v6 = vsel %vm1319_vm13, %v2166_v20, %v2168_v40 }
 0x515   : > { %v4301_v49 = vpop.f32.mrf.mxu1 }
 0x516   : > { %v2170_v42 = vpop.permute.xlu0 %2169  ;;  %v2162_v50 = vpop.permute.xlu1 %2161 }
 0x517   : > { %v1705_v29 = vpop.f32.mrf.mxu1  ;;  %v2194_v39 = vsel %vm1319_vm13, %v2170_v42, %v2172_v32 }
 0x518   : > { %1937 = vmatmul.mubr.f32.vlgmr.msra.gmra.mxu1 %v1705_v29 }
 0x519   : > { %2676 = vmatpush3.msra.mxu1 %v2198_v36  ;;  %2693 = vmatprep.mubr.msk.f32.mxu1 %vm3190_vm12, %v4509_v0 }
 0x51a   : > { %2677 = vmatprep.subr.mxu1 %v4509_v0  ;;  %v2164_v54 = vpop.permute.xlu0 %2163  ;;  %v2160_v7 = vpop.permute.xlu1 %2159 }
 0x51b   : > { %2678 = vmatpush3.msra.mxu1 %v2197_v30  ;;  %v2192_v9 = vsel %vm1319_vm13, %v2162_v50, %v2164_v54  ;;  %v2191_v12 = vsel %vm1319_vm13, %v3965_v46, %v2160_v7 }
 0x51c   : > { %2679 = vmatprep.subr.mxu1 %v4509_v0 }
 0x51d   : > { %2680 = vmatpush3.msra.mxu1 %v2196_v35 }
 0x51e   : > { %2681 = vmatprep.subr.mxu1 %v4509_v0 }
 0x51f   : > { %2682 = vmatpush3.msra.mxu1 %v2195_v5 }
 0x520   : > { %2683 = vmatprep.subr.mxu1 %v4509_v0 }
 0x521   : > { %2684 = vmatpush3.msra.mxu1 %v2174_v24 }
 0x522   : > { %2685 = vmatprep.subr.mxu1 %v4509_v0 }
 0x523   : > { %2686 = vmatpush3.msra.mxu1 %v2194_v39 }
 0x524   : > { %2687 = vmatprep.subr.mxu1 %v4509_v0 }
 0x525   : > { %2688 = vmatpush3.msra.mxu1 %v2193_v6 }
 0x526   : > { %2689 = vmatprep.subr.mxu1 %v4509_v0 }
 0x527   : > { %2690 = vmatpush3.msra.mxu1 %v2192_v9  ;;  %v2135_v17 = vpop.permute.xlu0 %2134 }
 0x528   : > { %2691 = vmatprep.subr.mxu1 %v4509_v0 }
 0x529   : > { %2692 = vmatpush3.msra.mxu1 %v2191_v12 }
 0x52a   : > { %2694 = vmatmul.mubr.msk.f32.vlgmr.msra.gmra.mxu1 %vm1014_vm11, %v1784_v10 }
 0x5be   : > { %v2126_v16 = vpop.f32.mrf.mxu0 }
 0x5c0   : > { %v2128_v13 = vpop.f32.mrf.mxu0 }
 0x5d8   : > { %v1938_v28 = vpop.f32.mrf.mxu1 }
 0x5d9   : > { %v2127_v15 = vadd.f32 %v2126_v16, %v1938_v28 }
 0x5da   : > { %v1940_v53 = vpop.f32.mrf.mxu1 }
 0x5db   : > { %v2137_v52 = vadd.f32 %v2135_v17, %v2127_v15  ;;  %v2129_v18 = vadd.f32 %v2128_v13, %v1940_v53 }
 0x5dd   : > { %v2139_v0 = vmax.f32 %v2137_v52, 0.0  ;;  %v2138_v46 = vadd.f32 %v2135_v17, %v2129_v18 }
 0x5df   : > { %2141 = vst [vmem:[%s602_s27] sm:$0xff] %v2139_v0  ;;  %v2140_v19 = vmax.f32 %v2138_v46, 0.0 }
 0x5e1   : > { %2142 = vst [vmem:[%s602_s27 + $0x8] sm:$0xff] %v2140_v19 }
 0x5e2   : > { %3064 = shalt.err (!%p3061_p0)
}
 0x5e3   : > { %s3065_s18 = scalar_lea.hbm %s2308_s24, 256  ;;  %s3069_s27 = scalar_lea.hbm %s4394_s14, 512 }
 0x5e4   : > { %p3066_p12 = scmp.ne.s32.totalorder %s2308_s24, %s3065_s18  ;;  %p3070_p3 = scmp.lt.s32.totalorder %s2308_s24, %s4394_s14 }
 0x5e5   : > { %p3071_p9 = scmp.lt.s32.totalorder %s3069_s27, %s3065_s18 }
 0x5e6   : > { %p3067_p1 = pnand %p3066_p12, %p4547_p6 }
 0x5e7   : > { %p3072_p4 = por %p3071_p9, %p3070_p3 }
 0x5e8   : > { %p3068_p2 = pneg %p3067_p1 }
 0x5ea   : > { %p3073_p5 = pnand %p3072_p4, %p3068_p2 }
 0x5ec   : > { %3076 = shalt.err (!%p3073_p5)
}
 0x5ed   : > { %2728 = dma.vmem_to_hbm [thread:$0]  (%p4547_p6), %s2311_s20, 256, %s2308_s24, %s2291_s29   ;;  %v2277_v21 = vpop.f32.mrf.mxu1  ;;  %v2285_v63 = vpop.permute.xlu1 %2284 }
 0x5ee   : > { %s2514_s17 = sshll.u32 %s4324_s30, 3  ;;  %v2278_v61 = vadd.f32 %v4301_v49, %v2277_v21  ;;  %s2527_s2 = sshll.u32 %s3294_s22, 7 }
 0x5ef   : > { %v2695_v33 = vpop.f32.mrf.mxu1  ;;  %s609_s21 = scalar_lea.vmem [#allocation17], %s2514_s17  ;;  %s2321_s5 = scalar_lea.hbm %s4395_s15, %s2527_s2 }
 0x5f0   : > { %s2323_s23 = sshll.u32 %s609_s21, 4  ;;  %v2287_v58 = vadd.f32 %v2285_v63, %v2278_v61  ;;  %s2296_s27 = scalar_lea.sflag [#allocation18], %s4324_s30  ;;  %s2324_s23 = int_to_ptr.vmem [resolvable:$true] %s2323_s23 }
 0x5f1   : > { %s3077_s20 = scalar_lea.vmem %s2324_s23, 128  ;;  %s3192_s24 = smov [#allocation17]  }
 0x5f2   : > { %v2288_v22 = vmax.f32 %v2287_v58, 0.0  ;;  %p3078_p10 = scmp.ne.s32.totalorder %s2324_s23, %s3077_s20  ;;  %s3081_s29 = sshll.u32 %s3192_s24, 4  ;;  %s3082_s29 = int_to_ptr.vmem [resolvable:$false] %s3081_s29 }
 0x5f3   : > { %s3083_s22 = scalar_lea.vmem %s3082_s29, 256  ;;  %p3084_p8 = scmp.lt.s32.totalorder %s2324_s23, %s3082_s29 }
 0x5f4   : > { %2289 = vst [vmem:[%s609_s21] sm:$0xff] %v2288_v22  ;;  %p3079_p13 = pnand %p3078_p10, %p4547_p6  ;;  %p3085_p11 = scmp.lt.s32.totalorder %s3083_s22, %s3077_s20 }
 0x5f6   : > { %p3080_p7 = pneg %p3079_p13  ;;  %p3086_p0 = por %p3085_p11, %p3084_p8 }
 0x5f8   : > { %p3087_p12 = pnand %p3086_p0, %p3080_p7 }
 0x5fa   : > { %3090 = shalt.err (!%p3087_p12)
}
 0x5fb   : > { %s3091_s16 = scalar_lea.hbm %s2321_s5, 128  ;;  %s3095_s17 = scalar_lea.hbm %s4395_s15, 256 }
 0x5fc   : > { %p3092_p1 = scmp.ne.s32.totalorder %s2321_s5, %s3091_s16  ;;  %p3096_p9 = scmp.lt.s32.totalorder %s2321_s5, %s4395_s15 }
 0x5fd   : > { %p3097_p4 = scmp.lt.s32.totalorder %s3095_s17, %s3091_s16 }
 0x5fe   : > { %p3093_p2 = pnand %p3092_p1, %p4547_p6 }
 0x5ff   : > { %p3098_p5 = por %p3097_p4, %p3096_p9 }
 0x600   : > { %p3094_p3 = pneg %p3093_p2 }
 0x602   : > { %p3099_p10 = pnand %p3098_p5, %p3094_p3 }
 0x604   : > { %3102 = shalt.err (!%p3099_p10)
}
 0x605   : > { %2729 = dma.vmem_to_hbm [thread:$0]  (%p4547_p6), %s2324_s23, 128, %s2321_s5, %s2296_s27  }
 0x606 PF: > { %s4548_s18 = sld [smem:[#allocation28_spill]] }
 0x607   : > { %s4549_s26 = sld [smem:[#allocation26_spill]] }
 0x608   : > { %s4550_s20 = sld [smem:[#allocation31_spill]] }
 0x60c   : > { %p2780_p13 = scmp.ge.s32.totalorder %s4548_s18, 2 }
 0x60d   : > { %s2335_s24 = sand.u32 1, %s4549_s26  }
 0x60e   : > { %p4551_p7 = scmp.ne.s32.totalorder %s4550_s20, 0  ;;  %s2336_s29 = scalar_lea.sflag [#allocation4], %s2335_s24 }
 0x610   : > { %p2758_p8 = pnand %p2780_p13, %p4551_p7 }
 0x612   : > { %p2759_p11 = pneg %p2758_p8 }
 0x614   : > { %3140 = dma.done.wait (%p2759_p11), %s2336_s29, 256  }
 0x615   : > { %3142 = vsyncadd (%p2759_p11), %s2336_s29, 4294967040  ;;  %s2345_s22 = scalar_lea.sflag [#allocation18], %s2335_s24 }
 0x616   : > { %3144 = dma.done.wait (%p2759_p11), %s2345_s22, 128  }
 0x617   : > { %3146 = vsyncadd (%p2759_p11), %s2345_s22, 4294967168  ;;  %s4552_s21 = sld [smem:[#allocation29_spill]]  ;;  %s4555_s18 = smov %s3153_s19 }
 0x618   : > { %s4553_s16 = sld [smem:[#allocation27_spill]] }
 0x619   : > { %s4554_s20 = sld [smem:[#allocation30_spill]] }
 0x61d   : > { %p34_p6 = scmp.ge.s32.totalorder %s4552_s21, 4  }
 0x61e   : > { %s4556_s19 = smov %s4553_s16 }
 0x61f   :  { %36 = sbr.rel (!%p34_p6) target bundleno = 13 (0xd), region = 161 }
 0x624   :  { %2350 = vsyncpa [#allocation3], 1 }
 0x625   :  { %2352 = vsyncpa [#allocation3 + $0x1], 1 }
 0x626   :  { %2353 = vsyncpa [#allocation6], 1 }
 0x627   :  { %2354 = vsyncpa [#allocation9], 1 }
 0x628   :  { %2355 = vsyncpa [#allocation12], 1 }
 0x629   :  { %2356 = vsyncpa [#allocation15], 1 }
 0x62a   :  { %2357 = vsyncpa [#allocation4], 1 }
 0x62b   :  { %2359 = vsyncpa [#allocation4 + $0x1], 1 }
 0x62c   :  { %2360 = vsyncpa [#allocation18], 1 }
 0x62d   :  { %2362 = vsyncpa [#allocation18 + $0x1], 1 }

</bundles_post_ra>
